<compile_context>
chip_gen: v6e
topology: v6e:2x2x1
jax: 0.10.0
libtpu: 0.0.40
codegen_flags: <defaults>
</compile_context>

<pallas_src>
import functools

import jax
import jax.numpy as jnp
from jax.experimental import pallas as pl
from jax.experimental.pallas import tpu as pltpu


# ----------------------------------------------------------------------------
# Helpers
# ----------------------------------------------------------------------------
def _round_up(x, m):
    return (x + m - 1) // m * m


def _plan_tiles(S, Dq, Dk, C, Cc, inner, num_heads, *, cross):
    """Generation-aware (spatial tile, padded extent, vmem limit)."""
    try:
        cap = int(getattr(pltpu.get_tpu_info(), "vmem_capacity_bytes", 0))
    except Exception:
        cap = 0
    if cap >= (96 << 20):          # v5e / v6e: 128 MiB VMEM per TensorCore
        budget, max_tile, vmem_limit = 56 << 20, 2048, 100 << 20
    else:                          # v7x (64 MiB per TC) or unknown: conservative
        budget, max_tile, vmem_limit = 20 << 20, 1024, 40 << 20

    lane = 128
    rup = lambda v: _round_up(v, lane)
    Cp, Ccp, innp, nhp = rup(C), rup(Cc), rup(inner), rup(num_heads)
    # f32 words resident in VMEM per spatial position:
    #  - pipelined x/out (and y) blocks: double-buffered, minor dim lane-padded
    #  - in-kernel intermediates: qkv, per-iq prod / exp-broadcast (buffers
    #    reused across the unrolled iq loop), lane-padded (ts, nh) softmax
    #    tensors, accumulators, per-iq projected outputs.
    elems = (2 * Dq * Cp           # x block (2 pipeline buffers)
             + 2 * Dq * Cp         # out block (2 pipeline buffers)
             + 3 * Dq * innp       # qkv (== q,k,v for self-attention)
             + 4 * Dk * innp       # per-iq prod + e@seg_t + slack
             + 4 * Dk * nhp        # scores / exp / denom (nh minor -> 128 pad)
             + 2 * Dq * innp       # attention accumulator + normalized output
             + 1 * Dq * Cp)        # projected per-iq outputs
    if cross:
        elems += 2 * Dk * Ccp + 2 * Dk * innp   # y block (2 buffers) + separate k,v
    per_pos = int(4 * elems * 1.25)             # f32 bytes + 25% compiler headroom

    ts_cap = max(8, min(max_tile, budget // max(per_pos, 1)))
    ts_cap = max(8, (ts_cap // 8) * 8)
    S8 = _round_up(S, 8)
    if ts_cap >= S8:
        return S8, S8, vmem_limit

    # Reduce spatial padding waste: among tiles within 2x of the budget-optimal
    # size pick the one minimizing round_up(S, ts) (ties -> larger tile).
    best_ts, best_pad = ts_cap, _round_up(S, ts_cap)
    lo = max(8, (ts_cap // 2) // 8 * 8)
    for cand in range(ts_cap - 8, lo - 1, -8):
        spad = _round_up(S, cand)
        if spad < best_pad:
            best_ts, best_pad = cand, spad
    return best_ts, best_pad, vmem_limit


def _segment_matrices(num_heads, head_dim):
    """Block-diagonal 0/1 matrices for per-head segment-sum / broadcast."""
    seg = jnp.repeat(jnp.eye(num_heads, dtype=jnp.float32), head_dim, axis=0)
    return seg, seg.T        # (inner, nh), (nh, inner)


# ----------------------------------------------------------------------------
# In-kernel attention + output projection (shared by self/cross kernels)
# ----------------------------------------------------------------------------
def _attend_and_project(q, k, v, seg, seg_t, wp_bf16, bp, o_ref, *,
                        dq_len, dk_len, num_heads, head_dim):
    """q: (Dq*ts, inner) f32 (already scaled); k, v: (Dk*ts, inner) f32.

    Writes the projected (ts, C) result for each query time-step directly to
    o_ref[iq].  inner = num_heads*head_dim stays lane-dense throughout; only
    the (.., nh) score tensors are narrow (inherent to the segment-matmul
    formulation, see header comment).
    """
    inner = num_heads * head_dim
    ts = q.shape[0] // dq_len
    qs = q.reshape(dq_len, ts, inner)
    ks = k.reshape(dk_len, ts, inner)
    vs = v.reshape(dk_len, ts, inner)

    for iq in range(dq_len):                                   # D is tiny: unroll
        # scores[dk, t, h] = sum_hd q[iq,t,h,hd] * k[dk,t,h,hd]
        prod = qs[iq][None, :, :] * ks                         # (Dk, ts, inner) VPU
        s = jnp.dot(prod.reshape(dk_len * ts, inner), seg,
                    preferred_element_type=jnp.float32)        # (Dk*ts, nh)  MXU
        s = s.reshape(dk_len, ts, num_heads)

        # numerically-stable softmax over the key/time axis, with deferred
        # normalization (no narrow p = e*inv multiply).
        m = jnp.max(s, axis=0, keepdims=True)                  # (1, ts, nh)
        e = jnp.exp(s - m)                                     # (Dk, ts, nh) EUP
        denom = jnp.sum(e, axis=0)                             # (ts, nh)
        inv = pl.reciprocal(denom, approx=True)                # EUP
        inv = inv * (2.0 - denom * inv)                        # one Newton step

        # broadcast un-normalized probs to per-head lane groups, contract over dk
        eb = jnp.dot(e.reshape(dk_len * ts, num_heads), seg_t,
                     preferred_element_type=jnp.float32)       # (Dk*ts, inner) MXU
        acc = jnp.sum(eb.reshape(dk_len, ts, inner) * vs, axis=0)   # (ts, inner)

        # normalize lane-dense: broadcast 1/denom to inner via tiny MXU matmul
        invb = jnp.dot(inv, seg_t, preferred_element_type=jnp.float32)  # (ts, inner)
        o_iq = acc * invb

        # output projection for this iq only (no (Dq*ts, inner) concat)
        out_iq = jnp.dot(o_iq.astype(jnp.bfloat16), wp_bf16,
                         preferred_element_type=jnp.float32) + bp      # (ts, C)
        o_ref[iq] = out_iq.astype(o_ref.dtype)


# ----------------------------------------------------------------------------
# Fused kernels
# ----------------------------------------------------------------------------
def _self_attn_kernel(x_ref, wqkv_ref, bqkv_ref, wp_ref, bp_ref,
                      seg_ref, segt_ref, o_ref, *, num_heads, head_dim):
    inner = num_heads * head_dim
    Dq, ts, C = x_ref.shape

    xm = x_ref[...].reshape(Dq * ts, C).astype(jnp.bfloat16)
    qkv = jnp.dot(xm, wqkv_ref[...],                       # bf16 x bf16 -> f32
                  preferred_element_type=jnp.float32) + bqkv_ref[...]
    q = qkv[:, :inner]                                     # scale already folded in
    k = qkv[:, inner:2 * inner]
    v = qkv[:, 2 * inner:]

    _attend_and_project(q, k, v, seg_ref[...], segt_ref[...],
                        wp_ref[...], bp_ref[...], o_ref,
                        dq_len=Dq, dk_len=Dq,
                        num_heads=num_heads, head_dim=head_dim)


def _cross_attn_kernel(x_ref, y_ref, wq_ref, bq_ref, wkv_ref, bkv_ref,
                       wp_ref, bp_ref, seg_ref, segt_ref, o_ref, *,
                       num_heads, head_dim):
    inner = num_heads * head_dim
    Dq, ts, C = x_ref.shape
    Dk, _, Cc = y_ref.shape

    xm = x_ref[...].reshape(Dq * ts, C).astype(jnp.bfloat16)
    ym = y_ref[...].reshape(Dk * ts, Cc).astype(jnp.bfloat16)

    q = jnp.dot(xm, wq_ref[...],
                preferred_element_type=jnp.float32) + bq_ref[...]   # scale folded
    kv = jnp.dot(ym, wkv_ref[...],
                 preferred_element_type=jnp.float32) + bkv_ref[...]
    k = kv[:, :inner]
    v = kv[:, inner:]

    _attend_and_project(q, k, v, seg_ref[...], segt_ref[...],
                        wp_ref[...], bp_ref[...], o_ref,
                        dq_len=Dq, dk_len=Dk,
                        num_heads=num_heads, head_dim=head_dim)


# ----------------------------------------------------------------------------
# TemporalAttention forward (wrapper)
# ----------------------------------------------------------------------------
def temporal_attention(x, y, params, *, num_heads, head_dim):
    B, Dq, H, W, C = x.shape
    inner = num_heads * head_dim
    scale = head_dim ** (-0.5)
    S = H * W
    x4 = x.reshape(B, Dq, S, C)

    if y is None:
        Dk, Cc = Dq, C
        y4 = None
    else:
        _, Dk, Hy, Wy, Cc = y.shape
        assert (Hy, Wy) == (H, W), "spatial dims of x and y must match"
        y4 = y.reshape(B, Dk, S, Cc)

    ts, S_pad, vmem_limit = _plan_tiles(S, Dq, Dk, C, Cc, inner, num_heads,
                                        cross=(y is not None))
    if S_pad != S:
        pad = [(0, 0), (0, 0), (0, S_pad - S), (0, 0)]
        x4 = jnp.pad(x4, pad)
        if y4 is not None:
            y4 = jnp.pad(y4, pad)

    # Spatial-tile axis first so megacore / v7x's 2 TCs split the larger extent.
    grid = (S_pad // ts, B)
    cparams = pltpu.CompilerParams(
        dimension_semantics=("parallel", "parallel"),
        vmem_limit_bytes=vmem_limit,
    )

    # Segment matrices built once here (not per-grid-step in the kernel).
    seg, seg_t = _segment_matrices(num_heads, head_dim)

    # Fold attn scale into Wq/bq; pre-cast matmul weights to bf16, biases stay f32.
    wq = (params["Wq"] * scale).astype(jnp.bfloat16)
    bq = (params["bq"] * scale).astype(jnp.float32).reshape(1, inner)
    wkv = params["Wkv"].astype(jnp.bfloat16)
    bkv = params["bkv"].astype(jnp.float32).reshape(1, 2 * inner)
    wp = params["Wp"].astype(jnp.bfloat16)
    bp = params["bp"].astype(jnp.float32).reshape(1, C)

    out_shape = jax.ShapeDtypeStruct((B, Dq, S_pad, C), x.dtype)
    out_spec = pl.BlockSpec((None, Dq, ts, C), lambda s, b: (b, 0, s, 0))

    def data_spec(d, ch):
        return pl.BlockSpec((None, d, ts, ch), lambda s, b: (b, 0, s, 0))

    def w_spec(shape):
        return pl.BlockSpec(shape, lambda s, b: (0, 0))

    if y is None:
        # Fused QKV projection: one read of x, wide MXU N = 3*inner.
        wqkv = jnp.concatenate([wq, wkv], axis=1)               # (C, 3*inner) bf16
        bqkv = jnp.concatenate([bq, bkv], axis=1)               # (1, 3*inner) f32
        kern = functools.partial(_self_attn_kernel, num_heads=num_heads,
                                 head_dim=head_dim)
        out = pl.pallas_call(
            kern,
            out_shape=out_shape,
            grid_spec=pltpu.PrefetchScalarGridSpec(
                num_scalar_prefetch=0,
                grid=grid,
                in_specs=[
                    data_spec(Dq, C),
                    w_spec((C, 3 * inner)),
                    w_spec((1, 3 * inner)),
                    w_spec((inner, C)),
                    w_spec((1, C)),
                    w_spec((inner, num_heads)),
                    w_spec((num_heads, inner)),
                ],
                out_specs=out_spec,
            ),
            compiler_params=cparams,
        )(x4, wqkv, bqkv, wp, bp, seg, seg_t)
    else:
        kern = functools.partial(_cross_attn_kernel, num_heads=num_heads,
                                 head_dim=head_dim)
        out = pl.pallas_call(
            kern,
            out_shape=out_shape,
            grid_spec=pltpu.PrefetchScalarGridSpec(
                num_scalar_prefetch=0,
                grid=grid,
                in_specs=[
                    data_spec(Dq, C),
                    data_spec(Dk, Cc),
                    w_spec((C, inner)),
                    w_spec((1, inner)),
                    w_spec((Cc, 2 * inner)),
                    w_spec((1, 2 * inner)),
                    w_spec((inner, C)),
                    w_spec((1, C)),
                    w_spec((inner, num_heads)),
                    w_spec((num_heads, inner)),
                ],
                out_specs=out_spec,
            ),
            compiler_params=cparams,
        )(x4, y4, wq, bq, wkv, bkv, wp, bp, seg, seg_t)

    if S_pad != S:
        out = out[:, :, :S, :]
    return out.reshape(B, Dq, H, W, C)


# ----------------------------------------------------------------------------
# Pure-JAX reference (mirrors the PyTorch forward exactly, full f32)
# ----------------------------------------------------------------------------
def reference(x, y, params, *, num_heads, head_dim):
    if y is None:
        y = x
    inner = num_heads * head_dim
    kv = y @ params["Wkv"] + params["bkv"]
    K, V = kv[..., :inner], kv[..., inner:]
    B, Dk, H, W, _ = K.shape
    K = K.reshape(B, Dk, H, W, num_heads, head_dim)
    V = V.reshape(B, Dk, H, W, num_heads, head_dim)
    Q = x @ params["Wq"] + params["bq"]
    Dq = x.shape[1]
    Q = Q.reshape(B, Dq, H, W, num_heads, head_dim)
    Kp = jnp.transpose(K, (0, 2, 3, 4, 5, 1))   # (B,H,W,nh,hd,Dk)
    Vp = jnp.transpose(V, (0, 2, 3, 4, 1, 5))   # (B,H,W,nh,Dk,hd)
    Qp = jnp.transpose(Q, (0, 2, 3, 4, 1, 5))   # (B,H,W,nh,Dq,hd)
    attn = jnp.matmul(Qp, Kp) * head_dim ** (-0.5)
    attn = jax.nn.softmax(attn, axis=-1)
    o = jnp.matmul(attn, Vp)
    o = jnp.transpose(o, (0, 4, 1, 2, 3, 5)).reshape(B, Dq, H, W, inner)
    return o @ params["Wp"] + params["bp"]


# ----------------------------------------------------------------------------
if __name__ == "__main__":
    B, D, H, W = 2, 4, 4, 4          # D = temporal length
    channels = 32
    head_dim = 32
    num_heads = 8
    inner = head_dim * num_heads

    key = jax.random.PRNGKey(0)
    keys = jax.random.split(key, 12)

    params_self = {
        "Wkv": jax.random.normal(keys[0], (channels, 2 * inner), jnp.float32) * 0.05,
        "bkv": jax.random.normal(keys[1], (2 * inner,), jnp.float32) * 0.01,
        "Wq":  jax.random.normal(keys[2], (channels, inner), jnp.float32) * 0.05,
        "bq":  jax.random.normal(keys[3], (inner,), jnp.float32) * 0.01,
        "Wp":  jax.random.normal(keys[4], (inner, channels), jnp.float32) * 0.05,
        "bp":  jax.random.normal(keys[5], (channels,), jnp.float32) * 0.01,
    }
    x = jax.random.normal(keys[6], (B, D, H, W, channels), jnp.float32)

    attn_fn = jax.jit(temporal_attention, static_argnames=("num_heads", "head_dim"))

    # bf16 MXU operands -> compare against the pure-f32 reference with a
    # tolerance appropriate for bf16 matmul rounding (outputs are O(0.2)).
    TOL = 3e-2

    # --- self-attention (y is None): fused QKV path ---
    out_self = jax.block_until_ready(
        attn_fn(x, None, params_self, num_heads=num_heads, head_dim=head_dim))
    ref_self = reference(x, None, params_self, num_heads=num_heads, head_dim=head_dim)
    assert out_self.shape == (B, D, H, W, channels)
    err = float(jnp.max(jnp.abs(out_self - ref_self)))
    assert err < TOL, f"self-attn max abs err = {err}"

    # --- cross-attention: separate context with different Dk / context_channels ---
    context_channels = 48
    Dk = 6
    params_cross = dict(params_self)
    params_cross["Wkv"] = jax.random.normal(
        keys[7], (context_channels, 2 * inner), jnp.float32) * 0.05
    params_cross["bkv"] = jax.random.normal(keys[8], (2 * inner,), jnp.float32) * 0.01
    y = jax.random.normal(keys[9], (B, Dk, H, W, context_channels), jnp.float32)

    out_cross = jax.block_until_ready(
        attn_fn(x, y, params_cross, num_heads=num_heads, head_dim=head_dim))
    ref_cross = reference(x, y, params_cross, num_heads=num_heads, head_dim=head_dim)
    assert out_cross.shape == (B, D, H, W, channels)
    err = float(jnp.max(jnp.abs(out_cross - ref_cross)))
    assert err < TOL, f"cross-attn max abs err = {err}"

    print("KERNEL_OK")
</pallas_src>

<mosaic_0001>
module attributes {stable_mosaic.version = 11 : i64} {
  func.func @_self_attn_kernel(%arg0: i32, %arg1: i32, %arg2: memref<1x4x16x32xf32, #tpu.memory_space<vmem>>, %arg3: memref<32x768xbf16, #tpu.memory_space<vmem>>, %arg4: memref<1x768xf32, #tpu.memory_space<vmem>>, %arg5: memref<256x32xbf16, #tpu.memory_space<vmem>>, %arg6: memref<1x32xf32, #tpu.memory_space<vmem>>, %arg7: memref<256x8xf32, #tpu.memory_space<vmem>>, %arg8: memref<8x256xf32, #tpu.memory_space<vmem>>, %arg9: memref<1x4x16x32xf32, #tpu.memory_space<vmem>>) attributes {dimension_semantics = [#tpu.dimension_semantics<parallel>, #tpu.dimension_semantics<parallel>], iteration_bounds = array<i64: 1, 2>, scalar_prefetch = 0 : i64, scratch_operands = 0 : i64, tpu.core_type = #tpu.core_type<tc>, window_params = [{transform_indices = @transform_0, window_bounds = array<i64: 1, 4, 16, 32>}, {pipeline_mode = #tpu.pipeline_mode<synchronous>, transform_indices = @transform_1, window_bounds = array<i64: 32, 768>}, {pipeline_mode = #tpu.pipeline_mode<synchronous>, transform_indices = @transform_2, window_bounds = array<i64: 1, 768>}, {pipeline_mode = #tpu.pipeline_mode<synchronous>, transform_indices = @transform_3, window_bounds = array<i64: 256, 32>}, {pipeline_mode = #tpu.pipeline_mode<synchronous>, transform_indices = @transform_4, window_bounds = array<i64: 1, 32>}, {pipeline_mode = #tpu.pipeline_mode<synchronous>, transform_indices = @transform_5, window_bounds = array<i64: 256, 8>}, {pipeline_mode = #tpu.pipeline_mode<synchronous>, transform_indices = @transform_6, window_bounds = array<i64: 8, 256>}, {transform_indices = @transform_7, window_bounds = array<i64: 1, 4, 16, 32>}]} {
    %c0 = arith.constant 0 : index
    %c0_0 = arith.constant 0 : index
    %c0_1 = arith.constant 0 : index
    %c0_2 = arith.constant 0 : index
    %0 = vector.load %arg2[%c0, %c0_0, %c0_1, %c0_2] : memref<1x4x16x32xf32, #tpu.memory_space<vmem>>, vector<1x4x16x32xf32>
    %1 = vector.shape_cast %0 : vector<1x4x16x32xf32> to vector<4x16x32xf32>
    %2 = vector.shape_cast %1 : vector<4x16x32xf32> to vector<64x32xf32>
    %3 = arith.truncf %2 : vector<64x32xf32> to vector<64x32xbf16>
    %c0_3 = arith.constant 0 : index
    %c0_4 = arith.constant 0 : index
    %4 = vector.load %arg3[%c0_3, %c0_4] : memref<32x768xbf16, #tpu.memory_space<vmem>>, vector<32x768xbf16>
    %cst = arith.constant dense<0.000000e+00> : vector<64x768xf32>
    %5 = tpu.matmul %3, %4, %cst {dimension_numbers = #tpu.dot_dimension_numbers<[1], [0], [0], [1], [0, 0, 1, 1], [], []>} : vector<64x32xbf16>, vector<32x768xbf16>, vector<64x768xf32> -> vector<64x768xf32>
    %c0_5 = arith.constant 0 : index
    %c0_6 = arith.constant 0 : index
    %6 = vector.load %arg4[%c0_5, %c0_6] : memref<1x768xf32, #tpu.memory_space<vmem>>, vector<1x768xf32>
    %7 = vector.broadcast %6 : vector<1x768xf32> to vector<64x768xf32>
    %8 = arith.addf %5, %7 : vector<64x768xf32>
    %9 = vector.extract_strided_slice %8 {offsets = [0, 0], sizes = [64, 256], strides = [1, 1]} : vector<64x768xf32> to vector<64x256xf32>
    %10 = vector.extract_strided_slice %8 {offsets = [0, 256], sizes = [64, 256], strides = [1, 1]} : vector<64x768xf32> to vector<64x256xf32>
    %11 = vector.extract_strided_slice %8 {offsets = [0, 512], sizes = [64, 256], strides = [1, 1]} : vector<64x768xf32> to vector<64x256xf32>
    %c0_7 = arith.constant 0 : index
    %c0_8 = arith.constant 0 : index
    %12 = vector.load %arg7[%c0_7, %c0_8] : memref<256x8xf32, #tpu.memory_space<vmem>>, vector<256x8xf32>
    %c0_9 = arith.constant 0 : index
    %c0_10 = arith.constant 0 : index
    %13 = vector.load %arg8[%c0_9, %c0_10] : memref<8x256xf32, #tpu.memory_space<vmem>>, vector<8x256xf32>
    %c0_11 = arith.constant 0 : index
    %c0_12 = arith.constant 0 : index
    %14 = vector.load %arg5[%c0_11, %c0_12] : memref<256x32xbf16, #tpu.memory_space<vmem>>, vector<256x32xbf16>
    %c0_13 = arith.constant 0 : index
    %c0_14 = arith.constant 0 : index
    %15 = vector.load %arg6[%c0_13, %c0_14] : memref<1x32xf32, #tpu.memory_space<vmem>>, vector<1x32xf32>
    %16 = vector.shape_cast %9 : vector<64x256xf32> to vector<4x16x256xf32>
    %17 = vector.shape_cast %10 : vector<64x256xf32> to vector<4x16x256xf32>
    %18 = vector.shape_cast %11 : vector<64x256xf32> to vector<4x16x256xf32>
    %19 = vector.extract_strided_slice %16 {offsets = [0, 0, 0], sizes = [1, 16, 256], strides = [1, 1, 1]} : vector<4x16x256xf32> to vector<1x16x256xf32>
    %20 = vector.shape_cast %19 : vector<1x16x256xf32> to vector<16x256xf32>
    %21 = vector.shape_cast %20 : vector<16x256xf32> to vector<1x16x256xf32>
    %22 = vector.broadcast %21 : vector<1x16x256xf32> to vector<4x16x256xf32>
    %23 = arith.mulf %22, %17 : vector<4x16x256xf32>
    %24 = vector.shape_cast %23 : vector<4x16x256xf32> to vector<64x256xf32>
    %cst_15 = arith.constant dense<0.000000e+00> : vector<64x8xf32>
    %25 = tpu.matmul %24, %12, %cst_15 {dimension_numbers = #tpu.dot_dimension_numbers<[1], [0], [0], [1], [0, 0, 1, 1], [], []>} : vector<64x256xf32>, vector<256x8xf32>, vector<64x8xf32> -> vector<64x8xf32>
    %26 = vector.shape_cast %25 : vector<64x8xf32> to vector<4x16x8xf32>
    %cst_16 = arith.constant dense<0xFF800000> : vector<16x8xf32>
    %27 = vector.multi_reduction <maximumf>, %26, %cst_16 [0] : vector<4x16x8xf32> to vector<16x8xf32>
    %28 = vector.shape_cast %27 : vector<16x8xf32> to vector<1x16x8xf32>
    %29 = vector.broadcast %28 : vector<1x16x8xf32> to vector<4x16x8xf32>
    %30 = arith.subf %26, %29 : vector<4x16x8xf32>
    %31 = math.exp %30 : vector<4x16x8xf32>
    %cst_17 = arith.constant dense<0.000000e+00> : vector<16x8xf32>
    %32 = vector.multi_reduction <add>, %31, %cst_17 [0] : vector<4x16x8xf32> to vector<16x8xf32>
    %33 = tpu.reciprocal %32 {approx = true} : vector<16x8xf32> -> vector<16x8xf32>
    %34 = arith.mulf %32, %33 : vector<16x8xf32>
    %cst_18 = arith.constant 2.000000e+00 : f32
    %35 = vector.broadcast %cst_18 : f32 to vector<16x8xf32>
    %36 = arith.subf %35, %34 : vector<16x8xf32>
    %37 = arith.mulf %33, %36 : vector<16x8xf32>
    %38 = vector.shape_cast %31 : vector<4x16x8xf32> to vector<64x8xf32>
    %cst_19 = arith.constant dense<0.000000e+00> : vector<64x256xf32>
    %39 = tpu.matmul %38, %13, %cst_19 {dimension_numbers = #tpu.dot_dimension_numbers<[1], [0], [0], [1], [0, 0, 1, 1], [], []>} : vector<64x8xf32>, vector<8x256xf32>, vector<64x256xf32> -> vector<64x256xf32>
    %40 = vector.shape_cast %39 : vector<64x256xf32> to vector<4x16x256xf32>
    %41 = arith.mulf %40, %18 : vector<4x16x256xf32>
    %cst_20 = arith.constant dense<0.000000e+00> : vector<16x256xf32>
    %42 = vector.multi_reduction <add>, %41, %cst_20 [0] : vector<4x16x256xf32> to vector<16x256xf32>
    %cst_21 = arith.constant dense<0.000000e+00> : vector<16x256xf32>
    %43 = tpu.matmul %37, %13, %cst_21 {dimension_numbers = #tpu.dot_dimension_numbers<[1], [0], [0], [1], [0, 0, 1, 1], [], []>} : vector<16x8xf32>, vector<8x256xf32>, vector<16x256xf32> -> vector<16x256xf32>
    %44 = arith.mulf %42, %43 : vector<16x256xf32>
    %45 = arith.truncf %44 : vector<16x256xf32> to vector<16x256xbf16>
    %cst_22 = arith.constant dense<0.000000e+00> : vector<16x32xf32>
    %46 = tpu.matmul %45, %14, %cst_22 {dimension_numbers = #tpu.dot_dimension_numbers<[1], [0], [0], [1], [0, 0, 1, 1], [], []>} : vector<16x256xbf16>, vector<256x32xbf16>, vector<16x32xf32> -> vector<16x32xf32>
    %47 = vector.broadcast %15 : vector<1x32xf32> to vector<16x32xf32>
    %48 = arith.addf %46, %47 : vector<16x32xf32>
    %c0_23 = arith.constant 0 : index
    %c0_24 = arith.constant 0 : index
    %c0_25 = arith.constant 0 : index
    %c0_26 = arith.constant 0 : index
    %49 = vector.load %arg9[%c0_23, %c0_24, %c0_25, %c0_26] : memref<1x4x16x32xf32, #tpu.memory_space<vmem>>, vector<1x1x16x32xf32>
    %50 = vector.shape_cast %49 : vector<1x1x16x32xf32> to vector<16x32xf32>
    %51 = vector.shape_cast %48 : vector<16x32xf32> to vector<1x1x16x32xf32>
    tpu.vector_store %arg9[%c0_23, %c0_24, %c0_25, %c0_26], %51 {strides = array<i32>} : memref<1x4x16x32xf32, #tpu.memory_space<vmem>>, vector<1x1x16x32xf32>,
    %52 = vector.extract_strided_slice %16 {offsets = [1, 0, 0], sizes = [1, 16, 256], strides = [1, 1, 1]} : vector<4x16x256xf32> to vector<1x16x256xf32>
    %53 = vector.shape_cast %52 : vector<1x16x256xf32> to vector<16x256xf32>
    %54 = vector.shape_cast %53 : vector<16x256xf32> to vector<1x16x256xf32>
    %55 = vector.broadcast %54 : vector<1x16x256xf32> to vector<4x16x256xf32>
    %56 = arith.mulf %55, %17 : vector<4x16x256xf32>
    %57 = vector.shape_cast %56 : vector<4x16x256xf32> to vector<64x256xf32>
    %cst_27 = arith.constant dense<0.000000e+00> : vector<64x8xf32>
    %58 = tpu.matmul %57, %12, %cst_27 {dimension_numbers = #tpu.dot_dimension_numbers<[1], [0], [0], [1], [0, 0, 1, 1], [], []>} : vector<64x256xf32>, vector<256x8xf32>, vector<64x8xf32> -> vector<64x8xf32>
    %59 = vector.shape_cast %58 : vector<64x8xf32> to vector<4x16x8xf32>
    %cst_28 = arith.constant dense<0xFF800000> : vector<16x8xf32>
    %60 = vector.multi_reduction <maximumf>, %59, %cst_28 [0] : vector<4x16x8xf32> to vector<16x8xf32>
    %61 = vector.shape_cast %60 : vector<16x8xf32> to vector<1x16x8xf32>
    %62 = vector.broadcast %61 : vector<1x16x8xf32> to vector<4x16x8xf32>
    %63 = arith.subf %59, %62 : vector<4x16x8xf32>
    %64 = math.exp %63 : vector<4x16x8xf32>
    %cst_29 = arith.constant dense<0.000000e+00> : vector<16x8xf32>
    %65 = vector.multi_reduction <add>, %64, %cst_29 [0] : vector<4x16x8xf32> to vector<16x8xf32>
    %66 = tpu.reciprocal %65 {approx = true} : vector<16x8xf32> -> vector<16x8xf32>
    %67 = arith.mulf %65, %66 : vector<16x8xf32>
    %cst_30 = arith.constant 2.000000e+00 : f32
    %68 = vector.broadcast %cst_30 : f32 to vector<16x8xf32>
    %69 = arith.subf %68, %67 : vector<16x8xf32>
    %70 = arith.mulf %66, %69 : vector<16x8xf32>
    %71 = vector.shape_cast %64 : vector<4x16x8xf32> to vector<64x8xf32>
    %cst_31 = arith.constant dense<0.000000e+00> : vector<64x256xf32>
    %72 = tpu.matmul %71, %13, %cst_31 {dimension_numbers = #tpu.dot_dimension_numbers<[1], [0], [0], [1], [0, 0, 1, 1], [], []>} : vector<64x8xf32>, vector<8x256xf32>, vector<64x256xf32> -> vector<64x256xf32>
    %73 = vector.shape_cast %72 : vector<64x256xf32> to vector<4x16x256xf32>
    %74 = arith.mulf %73, %18 : vector<4x16x256xf32>
    %cst_32 = arith.constant dense<0.000000e+00> : vector<16x256xf32>
    %75 = vector.multi_reduction <add>, %74, %cst_32 [0] : vector<4x16x256xf32> to vector<16x256xf32>
    %cst_33 = arith.constant dense<0.000000e+00> : vector<16x256xf32>
    %76 = tpu.matmul %70, %13, %cst_33 {dimension_numbers = #tpu.dot_dimension_numbers<[1], [0], [0], [1], [0, 0, 1, 1], [], []>} : vector<16x8xf32>, vector<8x256xf32>, vector<16x256xf32> -> vector<16x256xf32>
    %77 = arith.mulf %75, %76 : vector<16x256xf32>
    %78 = arith.truncf %77 : vector<16x256xf32> to vector<16x256xbf16>
    %cst_34 = arith.constant dense<0.000000e+00> : vector<16x32xf32>
    %79 = tpu.matmul %78, %14, %cst_34 {dimension_numbers = #tpu.dot_dimension_numbers<[1], [0], [0], [1], [0, 0, 1, 1], [], []>} : vector<16x256xbf16>, vector<256x32xbf16>, vector<16x32xf32> -> vector<16x32xf32>
    %80 = vector.broadcast %15 : vector<1x32xf32> to vector<16x32xf32>
    %81 = arith.addf %79, %80 : vector<16x32xf32>
    %c0_35 = arith.constant 0 : index
    %c1 = arith.constant 1 : index
    %c0_36 = arith.constant 0 : index
    %c0_37 = arith.constant 0 : index
    %82 = vector.load %arg9[%c0_35, %c1, %c0_36, %c0_37] : memref<1x4x16x32xf32, #tpu.memory_space<vmem>>, vector<1x1x16x32xf32>
    %83 = vector.shape_cast %82 : vector<1x1x16x32xf32> to vector<16x32xf32>
    %84 = vector.shape_cast %81 : vector<16x32xf32> to vector<1x1x16x32xf32>
    tpu.vector_store %arg9[%c0_35, %c1, %c0_36, %c0_37], %84 {strides = array<i32>} : memref<1x4x16x32xf32, #tpu.memory_space<vmem>>, vector<1x1x16x32xf32>,
    %85 = vector.extract_strided_slice %16 {offsets = [2, 0, 0], sizes = [1, 16, 256], strides = [1, 1, 1]} : vector<4x16x256xf32> to vector<1x16x256xf32>
    %86 = vector.shape_cast %85 : vector<1x16x256xf32> to vector<16x256xf32>
    %87 = vector.shape_cast %86 : vector<16x256xf32> to vector<1x16x256xf32>
    %88 = vector.broadcast %87 : vector<1x16x256xf32> to vector<4x16x256xf32>
    %89 = arith.mulf %88, %17 : vector<4x16x256xf32>
    %90 = vector.shape_cast %89 : vector<4x16x256xf32> to vector<64x256xf32>
    %cst_38 = arith.constant dense<0.000000e+00> : vector<64x8xf32>
    %91 = tpu.matmul %90, %12, %cst_38 {dimension_numbers = #tpu.dot_dimension_numbers<[1], [0], [0], [1], [0, 0, 1, 1], [], []>} : vector<64x256xf32>, vector<256x8xf32>, vector<64x8xf32> -> vector<64x8xf32>
    %92 = vector.shape_cast %91 : vector<64x8xf32> to vector<4x16x8xf32>
    %cst_39 = arith.constant dense<0xFF800000> : vector<16x8xf32>
    %93 = vector.multi_reduction <maximumf>, %92, %cst_39 [0] : vector<4x16x8xf32> to vector<16x8xf32>
    %94 = vector.shape_cast %93 : vector<16x8xf32> to vector<1x16x8xf32>
    %95 = vector.broadcast %94 : vector<1x16x8xf32> to vector<4x16x8xf32>
    %96 = arith.subf %92, %95 : vector<4x16x8xf32>
    %97 = math.exp %96 : vector<4x16x8xf32>
    %cst_40 = arith.constant dense<0.000000e+00> : vector<16x8xf32>
    %98 = vector.multi_reduction <add>, %97, %cst_40 [0] : vector<4x16x8xf32> to vector<16x8xf32>
    %99 = tpu.reciprocal %98 {approx = true} : vector<16x8xf32> -> vector<16x8xf32>
    %100 = arith.mulf %98, %99 : vector<16x8xf32>
    %cst_41 = arith.constant 2.000000e+00 : f32
    %101 = vector.broadcast %cst_41 : f32 to vector<16x8xf32>
    %102 = arith.subf %101, %100 : vector<16x8xf32>
    %103 = arith.mulf %99, %102 : vector<16x8xf32>
    %104 = vector.shape_cast %97 : vector<4x16x8xf32> to vector<64x8xf32>
    %cst_42 = arith.constant dense<0.000000e+00> : vector<64x256xf32>
    %105 = tpu.matmul %104, %13, %cst_42 {dimension_numbers = #tpu.dot_dimension_numbers<[1], [0], [0], [1], [0, 0, 1, 1], [], []>} : vector<64x8xf32>, vector<8x256xf32>, vector<64x256xf32> -> vector<64x256xf32>
    %106 = vector.shape_cast %105 : vector<64x256xf32> to vector<4x16x256xf32>
    %107 = arith.mulf %106, %18 : vector<4x16x256xf32>
    %cst_43 = arith.constant dense<0.000000e+00> : vector<16x256xf32>
    %108 = vector.multi_reduction <add>, %107, %cst_43 [0] : vector<4x16x256xf32> to vector<16x256xf32>
    %cst_44 = arith.constant dense<0.000000e+00> : vector<16x256xf32>
    %109 = tpu.matmul %103, %13, %cst_44 {dimension_numbers = #tpu.dot_dimension_numbers<[1], [0], [0], [1], [0, 0, 1, 1], [], []>} : vector<16x8xf32>, vector<8x256xf32>, vector<16x256xf32> -> vector<16x256xf32>
    %110 = arith.mulf %108, %109 : vector<16x256xf32>
    %111 = arith.truncf %110 : vector<16x256xf32> to vector<16x256xbf16>
    %cst_45 = arith.constant dense<0.000000e+00> : vector<16x32xf32>
    %112 = tpu.matmul %111, %14, %cst_45 {dimension_numbers = #tpu.dot_dimension_numbers<[1], [0], [0], [1], [0, 0, 1, 1], [], []>} : vector<16x256xbf16>, vector<256x32xbf16>, vector<16x32xf32> -> vector<16x32xf32>
    %113 = vector.broadcast %15 : vector<1x32xf32> to vector<16x32xf32>
    %114 = arith.addf %112, %113 : vector<16x32xf32>
    %c0_46 = arith.constant 0 : index
    %c2 = arith.constant 2 : index
    %c0_47 = arith.constant 0 : index
    %c0_48 = arith.constant 0 : index
    %115 = vector.load %arg9[%c0_46, %c2, %c0_47, %c0_48] : memref<1x4x16x32xf32, #tpu.memory_space<vmem>>, vector<1x1x16x32xf32>
    %116 = vector.shape_cast %115 : vector<1x1x16x32xf32> to vector<16x32xf32>
    %117 = vector.shape_cast %114 : vector<16x32xf32> to vector<1x1x16x32xf32>
    tpu.vector_store %arg9[%c0_46, %c2, %c0_47, %c0_48], %117 {strides = array<i32>} : memref<1x4x16x32xf32, #tpu.memory_space<vmem>>, vector<1x1x16x32xf32>,
    %118 = vector.extract_strided_slice %16 {offsets = [3, 0, 0], sizes = [1, 16, 256], strides = [1, 1, 1]} : vector<4x16x256xf32> to vector<1x16x256xf32>
    %119 = vector.shape_cast %118 : vector<1x16x256xf32> to vector<16x256xf32>
    %120 = vector.shape_cast %119 : vector<16x256xf32> to vector<1x16x256xf32>
    %121 = vector.broadcast %120 : vector<1x16x256xf32> to vector<4x16x256xf32>
    %122 = arith.mulf %121, %17 : vector<4x16x256xf32>
    %123 = vector.shape_cast %122 : vector<4x16x256xf32> to vector<64x256xf32>
    %cst_49 = arith.constant dense<0.000000e+00> : vector<64x8xf32>
    %124 = tpu.matmul %123, %12, %cst_49 {dimension_numbers = #tpu.dot_dimension_numbers<[1], [0], [0], [1], [0, 0, 1, 1], [], []>} : vector<64x256xf32>, vector<256x8xf32>, vector<64x8xf32> -> vector<64x8xf32>
    %125 = vector.shape_cast %124 : vector<64x8xf32> to vector<4x16x8xf32>
    %cst_50 = arith.constant dense<0xFF800000> : vector<16x8xf32>
    %126 = vector.multi_reduction <maximumf>, %125, %cst_50 [0] : vector<4x16x8xf32> to vector<16x8xf32>
    %127 = vector.shape_cast %126 : vector<16x8xf32> to vector<1x16x8xf32>
    %128 = vector.broadcast %127 : vector<1x16x8xf32> to vector<4x16x8xf32>
    %129 = arith.subf %125, %128 : vector<4x16x8xf32>
    %130 = math.exp %129 : vector<4x16x8xf32>
    %cst_51 = arith.constant dense<0.000000e+00> : vector<16x8xf32>
    %131 = vector.multi_reduction <add>, %130, %cst_51 [0] : vector<4x16x8xf32> to vector<16x8xf32>
    %132 = tpu.reciprocal %131 {approx = true} : vector<16x8xf32> -> vector<16x8xf32>
    %133 = arith.mulf %131, %132 : vector<16x8xf32>
    %cst_52 = arith.constant 2.000000e+00 : f32
    %134 = vector.broadcast %cst_52 : f32 to vector<16x8xf32>
    %135 = arith.subf %134, %133 : vector<16x8xf32>
    %136 = arith.mulf %132, %135 : vector<16x8xf32>
    %137 = vector.shape_cast %130 : vector<4x16x8xf32> to vector<64x8xf32>
    %cst_53 = arith.constant dense<0.000000e+00> : vector<64x256xf32>
    %138 = tpu.matmul %137, %13, %cst_53 {dimension_numbers = #tpu.dot_dimension_numbers<[1], [0], [0], [1], [0, 0, 1, 1], [], []>} : vector<64x8xf32>, vector<8x256xf32>, vector<64x256xf32> -> vector<64x256xf32>
    %139 = vector.shape_cast %138 : vector<64x256xf32> to vector<4x16x256xf32>
    %140 = arith.mulf %139, %18 : vector<4x16x256xf32>
    %cst_54 = arith.constant dense<0.000000e+00> : vector<16x256xf32>
    %141 = vector.multi_reduction <add>, %140, %cst_54 [0] : vector<4x16x256xf32> to vector<16x256xf32>
    %cst_55 = arith.constant dense<0.000000e+00> : vector<16x256xf32>
    %142 = tpu.matmul %136, %13, %cst_55 {dimension_numbers = #tpu.dot_dimension_numbers<[1], [0], [0], [1], [0, 0, 1, 1], [], []>} : vector<16x8xf32>, vector<8x256xf32>, vector<16x256xf32> -> vector<16x256xf32>
    %143 = arith.mulf %141, %142 : vector<16x256xf32>
    %144 = arith.truncf %143 : vector<16x256xf32> to vector<16x256xbf16>
    %cst_56 = arith.constant dense<0.000000e+00> : vector<16x32xf32>
    %145 = tpu.matmul %144, %14, %cst_56 {dimension_numbers = #tpu.dot_dimension_numbers<[1], [0], [0], [1], [0, 0, 1, 1], [], []>} : vector<16x256xbf16>, vector<256x32xbf16>, vector<16x32xf32> -> vector<16x32xf32>
    %146 = vector.broadcast %15 : vector<1x32xf32> to vector<16x32xf32>
    %147 = arith.addf %145, %146 : vector<16x32xf32>
    %c0_57 = arith.constant 0 : index
    %c3 = arith.constant 3 : index
    %c0_58 = arith.constant 0 : index
    %c0_59 = arith.constant 0 : index
    %148 = vector.load %arg9[%c0_57, %c3, %c0_58, %c0_59] : memref<1x4x16x32xf32, #tpu.memory_space<vmem>>, vector<1x1x16x32xf32>
    %149 = vector.shape_cast %148 : vector<1x1x16x32xf32> to vector<16x32xf32>
    %150 = vector.shape_cast %147 : vector<16x32xf32> to vector<1x1x16x32xf32>
    tpu.vector_store %arg9[%c0_57, %c3, %c0_58, %c0_59], %150 {strides = array<i32>} : memref<1x4x16x32xf32, #tpu.memory_space<vmem>>, vector<1x1x16x32xf32>,
    return
  }
  func.func @transform_0(%arg0: i32, %arg1: i32) -> (i32, i32, i32, i32) {
    %c0_i32 = arith.constant 0 : i32
    %c0_i32_0 = arith.constant 0 : i32
    %c0_i32_1 = arith.constant 0 : i32
    return %arg1, %c0_i32, %arg0, %c0_i32_0 : i32, i32, i32, i32
  }
  func.func @transform_1(%arg0: i32, %arg1: i32) -> (i32, i32) {
    %c0_i32 = arith.constant 0 : i32
    %c0_i32_0 = arith.constant 0 : i32
    %c0_i32_1 = arith.constant 0 : i32
    return %c0_i32, %c0_i32_0 : i32, i32
  }
  func.func @transform_2(%arg0: i32, %arg1: i32) -> (i32, i32) {
    %c0_i32 = arith.constant 0 : i32
    %c0_i32_0 = arith.constant 0 : i32
    %c0_i32_1 = arith.constant 0 : i32
    return %c0_i32, %c0_i32_0 : i32, i32
  }
  func.func @transform_3(%arg0: i32, %arg1: i32) -> (i32, i32) {
    %c0_i32 = arith.constant 0 : i32
    %c0_i32_0 = arith.constant 0 : i32
    %c0_i32_1 = arith.constant 0 : i32
    return %c0_i32, %c0_i32_0 : i32, i32
  }
  func.func @transform_4(%arg0: i32, %arg1: i32) -> (i32, i32) {
    %c0_i32 = arith.constant 0 : i32
    %c0_i32_0 = arith.constant 0 : i32
    %c0_i32_1 = arith.constant 0 : i32
    return %c0_i32, %c0_i32_0 : i32, i32
  }
  func.func @transform_5(%arg0: i32, %arg1: i32) -> (i32, i32) {
    %c0_i32 = arith.constant 0 : i32
    %c0_i32_0 = arith.constant 0 : i32
    %c0_i32_1 = arith.constant 0 : i32
    return %c0_i32, %c0_i32_0 : i32, i32
  }
  func.func @transform_6(%arg0: i32, %arg1: i32) -> (i32, i32) {
    %c0_i32 = arith.constant 0 : i32
    %c0_i32_0 = arith.constant 0 : i32
    %c0_i32_1 = arith.constant 0 : i32
    return %c0_i32, %c0_i32_0 : i32, i32
  }
  func.func @transform_7(%arg0: i32, %arg1: i32) -> (i32, i32, i32, i32) {
    %c0_i32 = arith.constant 0 : i32
    %c0_i32_0 = arith.constant 0 : i32
    %c0_i32_1 = arith.constant 0 : i32
    return %arg1, %c0_i32, %arg0, %c0_i32_0 : i32, i32, i32, i32
  }
}

</mosaic_0001>

<bundles_post_ra>
// kernel: temporal_attention.1
= control target key start
LH: loop header
LB: loop body
LE: loop exit
PB: predicated region body
PF: predicated region fallthrough
CT: control target
= control target key end

     0   :  { %12 = vsyncpa [#allocation3], 0  ;;  %s5033_s0 = inlined_call_operand.vmem [shape: f32[2,4,16,32], index: 0, kind: input, shape index: {}]   ;;  %s5034_s1 = inlined_call_operand.vmem [shape: bf16[32,768], index: 1, kind: input, shape index: {}]   ;;  %s5035_s2 = inlined_call_operand.vmem [shape: f32[1,768], index: 2, kind: input, shape index: {}]   ;;  %s5036_s3 = inlined_call_operand.vmem [shape: bf16[256,32], index: 3, kind: input, shape index: {}]   ;;  %s5037_s4 = inlined_call_operand.vmem [shape: f32[1,32], index: 4, kind: input, shape index: {}]   ;;  %s5038_s5 = inlined_call_operand.vmem [shape: f32[256,8], index: 5, kind: input, shape index: {}]   ;;  %s5039_s6 = inlined_call_operand.vmem [shape: f32[8,256], index: 6, kind: input, shape index: {}]   ;;  %s5040_s7 = inlined_call_operand.hbm [shape: f32[2,4,16,32], index: 7, kind: output, shape index: {}]  }
   0x1   :  { %14 = vsyncpa [#allocation3 + $0x1], 0  ;;  %s3597_s24 = smov 0   ;;  %s3599_s25 = smov 0  }
   0x2   :  { %s3601_s26 = smov 0   ;;  %s3603_s27 = smov 0  }
   0x3   :  { %s3605_s28 = smov 0   ;;  %s3607_s29 = smov 0  }
   0x4 LB: > { %s2837_s30 = sadd.s32 4294967295, %s3550_s29   ;;  %s2838_s8 = sadd.s32 4294967294, %s3550_s29   ;;  %s3550_s29 = sphi %s3607_s29, %s20_s29   ;;  %s3546_s28 = sphi %s3605_s28, %s5261_s28   ;;  %s3542_s27 = sphi %s3603_s27, %s5260_s27   ;;  %s3538_s26 = sphi %s3601_s26, %s5259_s26   ;;  %s3534_s25 = sphi %s3599_s25, %s5258_s25   ;;  %s3530_s24 = sphi %s3597_s24, %s5257_s24  }
   0x5   : > { %s29_s9 = sadd.s32 1, %s3546_s28  ;;  %s195_s10 = sadd.s32 1, %s3538_s26 }
   0x6   : > { %p30_p0 = scmp.ge.s32.totalorder %s29_s9, 2  ;;  %p205_p1 = scmp.ne.s32.totalorder %s3538_s26, %s3534_s25 }
   0x7   : > { %p206_p2 = scmp.eq.s32.totalorder %s2837_s30, 1  ;;  %p211_p3 = scmp.ne.s32.totalorder %s3534_s25, %s3530_s24 }
   0x8   : > { %s5263_s9 = smov (%p30_p0, %s29_s9), 0  ;;  %p212_p5 = scmp.eq.s32.totalorder %s2838_s8, 1 }
   0x9   : > { %p3637_p4 = por %p206_p2, %p205_p1  ;;  %s190_s12 = ssub.s32 %s3546_s28, %s5263_s9 }
   0xa   : > { %p2841_p6 = scmp.ge.s32.totalorder %s3550_s29, 1  ;;  %p193_p7 = scmp.eq.s32.totalorder %s190_s12, 0 }
   0xb   : > { %p3644_p8 = por %p212_p5, %p211_p3  ;;  %p261_p9 = scmp.lt.s32.totalorder %s3550_s29, 3 }
   0xc   : > { %s3650_s14 = scalar_select %p193_p7, %s3538_s26, %s195_s10  }
   0xd   : > { %p262_p10 = pnand %p2841_p6, %p261_p9 }
   0xf   : > { %265 = sbr.rel (%p262_p10) target bundleno = 1848 (0x738), region = 48 }
  0x14   : > { %v3310_v0 = vld [vmem:[%s5034_s1 + $0x34] ss:$24 sps:$4 sm:$0xff]   ;;  %p298_p11 = scmp.lt.s32.totalorder %s3542_s27, 1  ;;  %v5041_v2 = vmov 0   ;;  %v3314_v3 = vld [vmem:[%s5034_s1 + $0x30] ss:$24 sps:$4 sm:$0xff]   ;;  %v335_v53 = vlaneseq }
  0x15   : > { %v3312_v1 = vld [vmem:[%s5034_s1 + $0x3c] ss:$24 sps:$4 sm:$0xff]   ;;  %470 = vmatprep.mubr.bf16.mxu0 %v5041_v2  ;;  %543 = vmatprep.mubr.bf16.mxu1 %v5041_v2  ;;  %v3315_v4 = vld [vmem:[%s5034_s1 + $0x38] ss:$24 sps:$4 sm:$0xff]   ;;  %v3318_v6 = vld [vmem:[%s5034_s1 + $0xc] ss:$24 sps:$4 sm:$0xff]  }
  0x16   : > { %450 = vmatprep.subr.bf16.mxu0 %v3310_v0  ;;  %s299_s23 = scalar_select %p298_p11, %s3542_s27, 1  ;;  %523 = vmatprep.subr.bf16.mxu1 %v3312_v1  ;;  %v3316_v5 = vld [vmem:[%s5034_s1 + $0x4] ss:$24 sps:$4 sm:$0xff]   ;;  %v3320_v7 = vld [vmem:[%s5034_s1] ss:$24 sps:$4 sm:$0xff]   ;;  %vm425_vm0 = vcmask 261120  }
  0x17   : > { %451 = vmatpush1.bf16.msra.mxu0 %v3314_v3  ;;  %524 = vmatpush1.bf16.msra.mxu1 %v3315_v4  ;;  %v3321_v8 = vld [vmem:[%s5034_s1 + $0x8] ss:$24 sps:$4 sm:$0xff]   ;;  %v3690_v11 = vld [vmem:[%s5038_s5 + $0xf8] sm:$0xff]  ;;  %v3707_v14 = vld [vmem:[%s5038_s5 + $0xf0] sm:$0xff]  ;;  %v3916_v54 = vshrl.u32 %v335_v53, 7  ;;  %vm845_vm1 = vcmask 64512  }
  0x18   : > { %s2937_s17 = sshll.u32 %s299_s23, 6  ;;  %452 = vmatprep.subr.bf16.mxu0 %v3316_v5  ;;  %525 = vmatprep.subr.bf16.mxu1 %v3318_v6  ;;  %v3698_v13 = vld [vmem:[%s5038_s5 + $0x78] sm:$0xff]  ;;  %v3716_v17 = vld [vmem:[%s5038_s5 + $0x70] sm:$0xff]  ;;  %v3722_v18 = vld [vmem:[%s5038_s5 + $0xe8] sm:$0xff]  ;;  %s294_s15 = sand.u32 1, %s3534_s25  }
  0x19   : > { %s3683_s22 = scalar_lea.vmem %s5033_s0, %s2937_s17  ;;  %v3728_v19 = vld [vmem:[%s5038_s5 + $0x68] sm:$0xff]  ;;  %v3736_v21 = vld [vmem:[%s5038_s5 + $0xe0] sm:$0xff]  ;;  %v3748_v23 = vld [vmem:[%s5038_s5 + $0xd8] sm:$0xff]  ;;  %5116 = vst [vmem:[#allocation22_spill] sm:$0xff] %v3916_v54  ;;  %v337_v55 = vsub.s32 0, %v3916_v54  ;;  %v345_v56 = vsub.s32 2, %v3916_v54 }
  0x1a   : > { %v309_v9 = vld [vmem:[%s3683_s22] sm:$0xff]  ;;  %v310_v10 = vld [vmem:[%s3683_s22 + $0x8] sm:$0xff]  ;;  %v311_v15 = vld [vmem:[%s3683_s22 + $0x10] sm:$0xff]  ;;  %v341_v58 = vsub.s32 1, %v3916_v54  ;;  %v349_v59 = vsub.s32 3, %v3916_v54  ;;  %s2842_s16 = sshll.u32 %s294_s15, 6 }
  0x1b   : > { %v3692_v12 = vpack.c.bf16 %v310_v10, %v309_v9  ;;  %453 = vmatpush1.bf16.msra.mxu0 %v3320_v7  ;;  %526 = vmatpush1.bf16.msra.mxu1 %v3321_v8  ;;  %v312_v16 = vld [vmem:[%s3683_s22 + $0x18] sm:$0xff]  ;;  %v3742_v22 = vld [vmem:[%s5038_s5 + $0x60] sm:$0xff]  ;;  %v314_v25 = vld [vmem:[%s3683_s22 + $0x28] sm:$0xff]  ;;  %s4718_s18 = scalar_lea.vmem [#allocation2], %s2842_s16  ;;  %s2938_s23 = sshll.u32 %s3542_s27, 10 }
  0x1c   : > { %2939 = vmatprep.subr.mxu1 %v3690_v11  ;;  %v3730_v20 = vpack.c.bf16 %v312_v16, %v311_v15  ;;  %v313_v24 = vld [vmem:[%s3683_s22 + $0x20] sm:$0xff]  ;;  %v3756_v26 = vld [vmem:[%s5038_s5 + $0x58] sm:$0xff]  ;;  %v3765_v27 = vld [vmem:[%s5038_s5 + $0xd0] sm:$0xff]  ;;  %s2758_s10 = sshll.u32 %s4718_s18, 4  ;;  %s4979_s17 = scalar_lea.hbm %s5040_s7, %s2938_s23  ;;  %s4981_s10 = int_to_ptr.vmem [resolvable:$true] %s2758_s10 }
  0x1d   : > { %v3772_v28 = vld [vmem:[%s5038_s5 + $0x50] sm:$0xff]  ;;  %v3778_v29 = vld [vmem:[%s5038_s5 + $0xc8] sm:$0xff]  ;;  %v3781_v30 = vpack.c.bf16 %v314_v25, %v313_v24  ;;  %v3794_v32 = vld [vmem:[%s5038_s5 + $0xc0] sm:$0xff]  ;;  %s4988_s27 = scalar_lea.sflag [#allocation3], %s294_s15  ;;  %s3554_s19 = smov [#allocation2]  }
  0x1e   : > { %2857 = vmatmul.mubr.msk.bf16.vlgmr.msra.gmra.mxu0 %vm425_vm0, %v3692_v12  ;;  %2861 = vmatmul.mubr.msk.bf16.vlgmr.msra.gmra.mxu1 %vm425_vm0, %v3692_v12  ;;  %v3788_v31 = vld [vmem:[%s5038_s5 + $0x48] sm:$0xff]  ;;  %v315_v33 = vld [vmem:[%s3683_s22 + $0x30] sm:$0xff]  ;;  %v316_v34 = vld [vmem:[%s3683_s22 + $0x38] sm:$0xff]  ;;  %s3474_s22 = scalar_lea.vmem %s4981_s10, 1024  ;;  %s3478_s20 = sshll.u32 %s3554_s19, 4  ;;  %s3479_s20 = int_to_ptr.vmem [resolvable:$false] %s3478_s20 }
  0x1f   : > { %480 = vmatprep.mubr.bf16.mxu0 %v5041_v2  ;;  %553 = vmatprep.mubr.bf16.mxu1 %v5041_v2  ;;  %v3808_v35 = vld [vmem:[%s5038_s5 + $0x40] sm:$0xff]  ;;  %v3814_v36 = vld [vmem:[%s5038_s5 + $0xb8] sm:$0xff]  ;;  %v3822_v38 = vpack.c.bf16 %v316_v34, %v315_v33  ;;  %v3828_v39 = vld [vmem:[%s5038_s5 + $0xb0] sm:$0xff]  ;;  %p3475_p12 = scmp.ne.s32.totalorder %s4981_s10, %s3474_s22  ;;  %s3480_s21 = scalar_lea.vmem %s3479_s20, 2048 }
  0x20   : > { %2940 = vmatpush3.msra.mxu1 %v3698_v13  ;;  %5099 = vst [vmem:[#allocation5_spill] sm:$0xff] %v3808_v35  ;;  %5100 = vst [vmem:[#allocation6_spill] sm:$0xff] %v3814_v36  ;;  %v3820_v37 = vld [vmem:[%s5038_s5 + $0x38] sm:$0xff]  ;;  %v3835_v40 = vld [vmem:[%s5038_s5 + $0x30] sm:$0xff]  ;;  %p3481_p1 = scmp.lt.s32.totalorder %s4981_s10, %s3479_s20  ;;  %p3482_p2 = scmp.lt.s32.totalorder %s3480_s21, %s3474_s22 }
  0x21   : > { %2941 = vmatprep.subr.mxu1 %v3707_v14  ;;  %5101 = vst [vmem:[#allocation7_spill] sm:$0xff] %v3820_v37  ;;  %5102 = vst [vmem:[#allocation8_spill] sm:$0xff] %v3828_v39  ;;  %v3841_v41 = vld [vmem:[%s5038_s5 + $0xa8] sm:$0xff]  ;;  %v3856_v43 = vld [vmem:[%s5038_s5 + $0xa0] sm:$0xff]  ;;  %p3476_p13 = pnand %p3475_p12, %p3637_p4 }
  0x22   : > { %2942 = vmatpush3.msra.mxu1 %v3716_v17  ;;  %5103 = vst [vmem:[#allocation9_spill] sm:$0xff] %v3835_v40  ;;  %5104 = vst [vmem:[#allocation10_spill] sm:$0xff] %v3841_v41  ;;  %v3850_v42 = vld [vmem:[%s5038_s5 + $0x28] sm:$0xff]  ;;  %v3863_v44 = vld [vmem:[%s5038_s5 + $0x20] sm:$0xff]  ;;  %p3483_p3 = por %p3482_p2, %p3481_p1 }
  0x23   : > { %2943 = vmatprep.subr.mxu1 %v3722_v18  ;;  %5105 = vst [vmem:[#allocation11_spill] sm:$0xff] %v3850_v42  ;;  %5106 = vst [vmem:[#allocation12_spill] sm:$0xff] %v3856_v43  ;;  %v3869_v45 = vld [vmem:[%s5038_s5 + $0x98] sm:$0xff]  ;;  %v3883_v47 = vld [vmem:[%s5038_s5 + $0x90] sm:$0xff]  ;;  %p3477_p0 = pneg %p3476_p13 }
  0x24   : > { %2944 = vmatpush3.msra.mxu1 %v3728_v19  ;;  %5107 = vst [vmem:[#allocation13_spill] sm:$0xff] %v3863_v44  ;;  %5108 = vst [vmem:[#allocation14_spill] sm:$0xff] %v3869_v45  ;;  %v3877_v46 = vld [vmem:[%s5038_s5 + $0x18] sm:$0xff]  ;;  %v3889_v48 = vld [vmem:[%s5038_s5 + $0x10] sm:$0xff] }
  0x25   : > { %2945 = vmatprep.subr.mxu1 %v3736_v21  ;;  %5109 = vst [vmem:[#allocation15_spill] sm:$0xff] %v3877_v46  ;;  %5110 = vst [vmem:[#allocation16_spill] sm:$0xff] %v3883_v47  ;;  %v3895_v49 = vld [vmem:[%s5038_s5 + $0x88] sm:$0xff]  ;;  %v3907_v51 = vld [vmem:[%s5038_s5 + $0x80] sm:$0xff]  ;;  %p3484_p5 = pnand %p3483_p3, %p3477_p0 }
  0x26   : > { %2858 = vmatmul.mubr.msk.bf16.gmra.mxu0 %vm425_vm0, %v3730_v20  ;;  %2862 = vmatmul.mubr.msk.bf16.gmra.mxu1 %vm425_vm0, %v3730_v20  ;;  %5111 = vst [vmem:[#allocation17_spill] sm:$0xff] %v3889_v48  ;;  %5112 = vst [vmem:[#allocation18_spill] sm:$0xff] %v3895_v49  ;;  %v3901_v50 = vld [vmem:[%s5038_s5 + $0x8] sm:$0xff]  ;;  %v3913_v52 = vld [vmem:[%s5038_s5] sm:$0xff] }
  0x27   : > { %490 = vmatprep.mubr.bf16.mxu0 %v5041_v2  ;;  %563 = vmatprep.mubr.bf16.mxu1 %v5041_v2  ;;  %5113 = vst [vmem:[#allocation19_spill] sm:$0xff] %v3901_v50  ;;  %5114 = vst [vmem:[#allocation20_spill] sm:$0xff] %v3907_v51  ;;  %v3923_v57 = vld [vmem:[%s5035_s2] sm:$0x3f] }
  0x28   : > { %2946 = vmatpush3.msra.mxu1 %v3742_v22  ;;  %5115 = vst [vmem:[#allocation21_spill] sm:$0xff] %v3913_v52  ;;  %5117 = vst [vmem:[#allocation23_spill] sm:$0xff] %v3923_v57  ;;  %v3928_v60 = vrot.slane %v3923_v57, %v337_v55  ;;  %v3931_v61 = vrot.slane %v3923_v57, %v345_v56  ;;  %v3934_v62 = vrot.slane %v3923_v57, %v341_v58 }
  0x29   : > { %2947 = vmatprep.subr.mxu1 %v3748_v23  ;;  %v3937_v63 = vrot.slane %v3923_v57, %v349_v59 }
  0x2a   : > { %2948 = vmatpush3.msra.mxu1 %v3756_v26 }
  0x2b   : > { %2949 = vmatprep.subr.mxu1 %v3765_v27 }
  0x2c   : > { %2950 = vmatpush3.msra.mxu1 %v3772_v28 }
  0x2d   : > { %2951 = vmatprep.subr.mxu1 %v3778_v29 }
  0x2e   : > { %2859 = vmatmul.mubr.msk.bf16.gmra.mxu0 %vm425_vm0, %v3781_v30  ;;  %2863 = vmatmul.mubr.msk.bf16.gmra.mxu1 %vm425_vm0, %v3781_v30 }
  0x2f   : > { %500 = vmatprep.mubr.bf16.mxu0 %v5041_v2  ;;  %573 = vmatprep.mubr.bf16.mxu1 %v5041_v2 }
  0x30   : > { %2952 = vmatpush3.msra.mxu1 %v3788_v31 }
  0x31   : > { %2953 = vmatprep.subr.mxu1 %v3794_v32 }
  0x32   : > { %2954 = vmatpush3.msra.mxu1 %v3808_v35 }
  0x33   : > { %2955 = vmatprep.subr.mxu1 %v3814_v36 }
  0x34   : > { %2956 = vmatpush3.msra.mxu1 %v3820_v37 }
  0x35   : > { %2957 = vmatprep.subr.mxu1 %v3828_v39 }
  0x36   : > { %2860 = vmatmul.mubr.msk.bf16.gmra.mxu0 %vm425_vm0, %v3822_v38  ;;  %2864 = vmatmul.mubr.msk.bf16.gmra.mxu1 %vm425_vm0, %v3822_v38 }
  0x37   : > { %2958 = vmatpush3.msra.mxu1 %v3835_v40  ;;  %616 = vmatprep.mubr.bf16.mxu0 %v5041_v2 }
  0x38   : > { %2959 = vmatprep.subr.mxu1 %v3841_v41 }
  0x39   : > { %2960 = vmatpush3.msra.mxu1 %v3850_v42 }
  0x3a   : > { %2961 = vmatprep.subr.mxu1 %v3856_v43 }
  0x3b   : > { %2962 = vmatpush3.msra.mxu1 %v3863_v44 }
  0x3c   : > { %2963 = vmatprep.subr.mxu1 %v3869_v45 }
  0x3d   : > { %2964 = vmatpush3.msra.mxu1 %v3877_v46 }
  0x3e   : > { %2965 = vmatprep.subr.mxu1 %v3883_v47 }
  0x3f   : > { %2966 = vmatpush3.msra.mxu1 %v3889_v48 }
  0x40   : > { %2967 = vmatprep.subr.mxu1 %v3895_v49 }
  0x41   : > { %2968 = vmatpush3.msra.mxu1 %v3901_v50 }
  0x42   : > { %2969 = vmatprep.subr.mxu1 %v3907_v51 }
  0x43   : > { %2970 = vmatpush3.msra.mxu1 %v3913_v52 }
  0xde   : > { %v472_v0 = vpop.f32.mrf.mxu0  ;;  %v545_v1 = vpop.f32.mrf.mxu1 }
  0xdf   : > { %v3940_v3 = vadd.f32 %v472_v0, %v3928_v60  ;;  %v3943_v4 = vadd.f32 %v545_v1, %v3931_v61 }
  0xe0   : > { %v474_v5 = vpop.f32.mrf.mxu0  ;;  %v547_v6 = vpop.f32.mrf.mxu1 }
  0xe1   : > { %v3946_v7 = vadd.f32 %v474_v5, %v3934_v62  ;;  %v3949_v8 = vadd.f32 %v547_v6, %v3937_v63  ;;  %v724_v16 = vmul.f32 %v3943_v4, %v3940_v3 }
  0xe2   : > { %v476_v9 = vpop.f32.mrf.mxu0  ;;  %v549_v10 = vpop.f32.mrf.mxu1 }
  0xe3   : > { %v725_v15 = vmul.f32 %v3949_v8, %v3946_v7  ;;  %v3956_v24 = vadd.f32 %v476_v9, %v3928_v60  ;;  %v3959_v25 = vadd.f32 %v549_v10, %v3931_v61 }
  0xe4   : > { %v478_v33 = vpop.f32.mrf.mxu0  ;;  %v551_v34 = vpop.f32.mrf.mxu1 }
  0xe5   : > { %v3962_v53 = vadd.f32 %v478_v33, %v3934_v62  ;;  %v3965_v55 = vadd.f32 %v551_v34, %v3937_v63  ;;  %804 = vmatprep.mubr.f32.mxu1 %v725_v15  ;;  %v726_v9 = vmul.f32 %v3959_v25, %v3956_v24 }
  0xe6   : > { %v482_v56 = vpop.f32.mrf.mxu0  ;;  %v555_v58 = vpop.f32.mrf.mxu1  ;;  %805 = vmatmul.mubr.f32.vlgmr.msra.gmra.mxu1 %v724_v16 }
  0xe7   : > { %v3968_v59 = vadd.f32 %v482_v56, %v3928_v60  ;;  %v3971_v0 = vadd.f32 %v555_v58, %v3931_v61  ;;  %v727_v1 = vmul.f32 %v3965_v55, %v3962_v53 }
  0xe8   : > { %v484_v5 = vpop.f32.mrf.mxu0  ;;  %v557_v6 = vpop.f32.mrf.mxu1 }
  0xe9   : > { %v3979_v10 = vmul.f32 %v3943_v4, %v3968_v59  ;;  %v3982_v15 = vadd.f32 %v484_v5, %v3934_v62  ;;  %v3985_v16 = vadd.f32 %v557_v6, %v3937_v63  ;;  %809 = vmatprep.mubr.f32.mxu1 %v727_v1  ;;  %v3989_v56 = vmul.f32 %v3971_v0, %v3968_v59 }
  0xea   : > { %v486_v33 = vpop.f32.mrf.mxu0  ;;  %v559_v34 = vpop.f32.mrf.mxu1  ;;  %810 = vmatmul.mubr.f32.gmra.mxu1 %v726_v9  ;;  %v728_v9 = vmul.f32 %v3971_v0, %v3940_v3 }
  0xeb   : > { %5118 = vst [vmem:[#allocation24_spill] sm:$0xff] %v3979_v10  ;;  %5119 = vst [vmem:[#allocation25_spill] sm:$0xff] %v3989_v56  ;;  %v3992_v58 = vadd.f32 %v486_v33, %v3928_v60  ;;  %v3995_v2 = vadd.f32 %v559_v34, %v3931_v61  ;;  %v729_v5 = vmul.f32 %v3985_v16, %v3946_v7 }
  0xec   : > { %v4001_v6 = vmul.f32 %v3949_v8, %v3982_v15  ;;  %v488_v1 = vpop.f32.mrf.mxu0  ;;  %v561_v57 = vpop.f32.mrf.mxu1  ;;  %v4007_v54 = vmul.f32 %v3985_v16, %v3982_v15 }
  0xed   : > { %v4010_v33 = vadd.f32 %v488_v1, %v3934_v62  ;;  %v4013_v34 = vadd.f32 %v561_v57, %v3937_v63  ;;  %814 = vmatprep.mubr.f32.mxu1 %v729_v5  ;;  %v4017_v56 = vmul.f32 %v3959_v25, %v3992_v58  ;;  %v4021_v51 = vmul.f32 %v3995_v2, %v3992_v58 }
  0xee   : > { %5120 = vst [vmem:[#allocation26_spill] sm:$0xff] %v4007_v54  ;;  %v492_v10 = vpop.f32.mrf.mxu0  ;;  %v565_v52 = vpop.f32.mrf.mxu1  ;;  %815 = vmatmul.mubr.f32.gmra.mxu1 %v728_v9  ;;  %v730_v9 = vmul.f32 %v3995_v2, %v3956_v24 }
  0xef   : > { %5121 = vst [vmem:[#allocation27_spill] sm:$0xff] %v4017_v56  ;;  %5122 = vst [vmem:[#allocation28_spill] sm:$0xff] %v4021_v51  ;;  %v493_v54 = vadd.f32 %v492_v10, %v3928_v60  ;;  %v566_v1 = vadd.f32 %v565_v52, %v3931_v61  ;;  %v731_v57 = vmul.f32 %v4013_v34, %v3962_v53 }
  0xf0   : > { %v4029_v5 = vmul.f32 %v3965_v55, %v4010_v33  ;;  %v494_v50 = vpop.f32.mrf.mxu0  ;;  %v567_v56 = vpop.f32.mrf.mxu1  ;;  %v4035_v49 = vmul.f32 %v4013_v34, %v4010_v33 }
  0xf1   : > { %v4038_v10 = vmul.f32 %v3943_v4, %v493_v54  ;;  %v495_v52 = vadd.f32 %v494_v50, %v3934_v62  ;;  %v568_v51 = vadd.f32 %v567_v56, %v3937_v63  ;;  %819 = vmatprep.mubr.f32.mxu1 %v731_v57  ;;  %v4046_v46 = vmul.f32 %v3971_v0, %v493_v54 }
  0xf2   : > { %5123 = vst [vmem:[#allocation29_spill] sm:$0xff] %v4029_v5  ;;  %5124 = vst [vmem:[#allocation30_spill] sm:$0xff] %v4035_v49  ;;  %v496_v48 = vpop.f32.mrf.mxu0  ;;  %v569_v47 = vpop.f32.mrf.mxu1  ;;  %820 = vmatmul.mubr.f32.gmra.mxu1 %v730_v9  ;;  %v4043_v5 = vmul.f32 %v566_v1, %v3968_v59  ;;  %v4048_v45 = vmul.f32 %v566_v1, %v493_v54  ;;  %v732_v9 = vmul.f32 %v566_v1, %v3940_v3 }
  0xf3   : > { %5125 = vst [vmem:[#allocation31_spill] sm:$0xff] %v4038_v10  ;;  %5127 = vst [vmem:[#allocation33_spill] sm:$0xff] %v4046_v46  ;;  %v497_v49 = vadd.f32 %v496_v48, %v3928_v60  ;;  %v570_v10 = vadd.f32 %v569_v47, %v3931_v61  ;;  %v733_v50 = vmul.f32 %v568_v51, %v3946_v7 }
  0xf4   : > { %5126 = vst [vmem:[#allocation32_spill] sm:$0xff] %v4043_v5  ;;  %5128 = vst [vmem:[#allocation34_spill] sm:$0xff] %v4048_v45  ;;  %v4054_v56 = vmul.f32 %v568_v51, %v3982_v15  ;;  %v498_v57 = vpop.f32.mrf.mxu0  ;;  %v571_v44 = vpop.f32.mrf.mxu1  ;;  %v4058_v5 = vmul.f32 %v3949_v8, %v495_v52  ;;  %v4061_v46 = vmul.f32 %v3985_v16, %v495_v52 }
  0xf5   : > { %v4063_v45 = vmul.f32 %v568_v51, %v495_v52  ;;  %v499_v48 = vadd.f32 %v498_v57, %v3934_v62  ;;  %v572_v47 = vadd.f32 %v571_v44, %v3937_v63  ;;  %824 = vmatprep.mubr.f32.mxu1 %v733_v50  ;;  %v4068_v43 = vmul.f32 %v570_v10, %v3992_v58 }
  0xf6   : > { %5129 = vst [vmem:[#allocation35_spill] sm:$0xff] %v4054_v56  ;;  %5130 = vst [vmem:[#allocation36_spill] sm:$0xff] %v4058_v5  ;;  %v502_v56 = vpop.f32.mrf.mxu0  ;;  %v575_v42 = vpop.f32.mrf.mxu1  ;;  %825 = vmatmul.mubr.f32.gmra.mxu1 %v732_v9  ;;  %v4071_v41 = vmul.f32 %v3959_v25, %v497_v49  ;;  %v4074_v5 = vmul.f32 %v3995_v2, %v497_v49  ;;  %v734_v9 = vmul.f32 %v570_v10, %v3956_v24 }
  0xf7   : > { %5131 = vst [vmem:[#allocation37_spill] sm:$0xff] %v4061_v46  ;;  %5132 = vst [vmem:[#allocation38_spill] sm:$0xff] %v4063_v45  ;;  %v4076_v46 = vmul.f32 %v570_v10, %v497_v49  ;;  %v503_v45 = vadd.f32 %v502_v56, %v3928_v60  ;;  %v576_v57 = vadd.f32 %v575_v42, %v3931_v61 }
  0xf8   : > { %5133 = vst [vmem:[#allocation39_spill] sm:$0xff] %v4068_v43  ;;  %5134 = vst [vmem:[#allocation40_spill] sm:$0xff] %v4071_v41  ;;  %v735_v44 = vmul.f32 %v572_v47, %v3962_v53  ;;  %v4082_v50 = vmul.f32 %v572_v47, %v4010_v33  ;;  %v504_v43 = vpop.f32.mrf.mxu0  ;;  %v577_v40 = vpop.f32.mrf.mxu1  ;;  %v4086_v41 = vmul.f32 %v3965_v55, %v499_v48 }
  0xf9   : > { %5135 = vst [vmem:[#allocation41_spill] sm:$0xff] %v4074_v5  ;;  %5136 = vst [vmem:[#allocation42_spill] sm:$0xff] %v4076_v46  ;;  %v4089_v5 = vmul.f32 %v4013_v34, %v499_v48  ;;  %v4091_v46 = vmul.f32 %v572_v47, %v499_v48  ;;  %v4094_v56 = vmul.f32 %v3943_v4, %v503_v45 }
  0xfa   : > { %5137 = vst [vmem:[#allocation43_spill] sm:$0xff] %v4082_v50  ;;  %5138 = vst [vmem:[#allocation44_spill] sm:$0xff] %v4086_v41  ;;  %v505_v42 = vadd.f32 %v504_v43, %v3934_v62  ;;  %v578_v39 = vadd.f32 %v577_v40, %v3937_v63  ;;  %829 = vmatprep.mubr.f32.mxu1 %v735_v44  ;;  %v736_v50 = vmul.f32 %v576_v57, %v3940_v3  ;;  %v506_v37 = vpop.f32.mrf.mxu0  ;;  %v579_v36 = vpop.f32.mrf.mxu1 }
  0xfb   : > { %5139 = vst [vmem:[#allocation45_spill] sm:$0xff] %v4091_v46  ;;  %5140 = vst [vmem:[#allocation46_spill] sm:$0xff] %v4094_v56  ;;  %830 = vmatmul.mubr.f32.gmra.mxu1 %v734_v9  ;;  %v4100_v41 = vmul.f32 %v576_v57, %v3968_v59  ;;  %v4102_v35 = vmul.f32 %v576_v57, %v493_v54  ;;  %v4105_v46 = vmul.f32 %v3971_v0, %v503_v45 }
  0xfc   : > { %v4107_v4 = vmul.f32 %v566_v1, %v503_v45  ;;  %v507_v43 = vadd.f32 %v506_v37, %v3928_v60  ;;  %v580_v40 = vadd.f32 %v579_v36, %v3931_v61  ;;  %v737_v44 = vmul.f32 %v578_v39, %v3946_v7  ;;  %v508_v9 = vpop.f32.mrf.mxu0  ;;  %v581_v56 = vpop.f32.mrf.mxu1 }
  0xfd   : > { %5141 = vst [vmem:[#allocation47_spill] sm:$0xff] %v4105_v46  ;;  %v4113_v3 = vmul.f32 %v578_v39, %v3982_v15  ;;  %v4115_v59 = vmul.f32 %v578_v39, %v495_v52  ;;  %v4118_v54 = vmul.f32 %v3949_v8, %v505_v42  ;;  %v4121_v0 = vmul.f32 %v3985_v16, %v505_v42  ;;  %v4189_v52 = vld [vmem:[%s5039_s6 + $0x8] sm:$0xff] }
  0xfe   : > { %5142 = vst [vmem:[#allocation48_spill] sm:$0xff] %v4107_v4  ;;  %v4123_v1 = vmul.f32 %v568_v51, %v505_v42  ;;  %v509_v37 = vadd.f32 %v508_v9, %v3934_v62  ;;  %v582_v36 = vadd.f32 %v581_v56, %v3937_v63  ;;  %834 = vmatprep.mubr.f32.mxu1 %v737_v44 }
  0xff   : > { %5143 = vst [vmem:[#allocation49_spill] sm:$0xff] %v4118_v54  ;;  %5144 = vst [vmem:[#allocation50_spill] sm:$0xff] %v4121_v0  ;;  %v738_v60 = vmul.f32 %v580_v40, %v3956_v24  ;;  %v4129_v61 = vmul.f32 %v580_v40, %v3992_v58  ;;  %835 = vmatmul.mubr.f32.gmra.mxu1 %v736_v50  ;;  %v4131_v7 = vmul.f32 %v580_v40, %v497_v49 }
 0x100   : > { %5145 = vst [vmem:[#allocation51_spill] sm:$0xff] %v4123_v1  ;;  %v4134_v8 = vmul.f32 %v3959_v25, %v507_v43  ;;  %v4137_v15 = vmul.f32 %v3995_v2, %v507_v43  ;;  %v4139_v51 = vmul.f32 %v570_v10, %v507_v43  ;;  %v739_v62 = vmul.f32 %v582_v36, %v3962_v53 }
 0x101   : > { %5146 = vst [vmem:[#allocation52_spill] sm:$0xff] %v4131_v7  ;;  %v4143_v63 = vmul.f32 %v582_v36, %v4010_v33  ;;  %v4145_v24 = vmul.f32 %v582_v36, %v499_v48  ;;  %v4148_v16 = vmul.f32 %v3965_v55, %v509_v37  ;;  %v4151_v49 = vmul.f32 %v4013_v34, %v509_v37  ;;  %v3324_v55 = vld [vmem:[%s5034_s1 + $0x44] ss:$24 sps:$4 sm:$0xff]   ;;  %v3322_v33 = vld [vmem:[%s5034_s1 + $0x40] ss:$24 sps:$4 sm:$0xff]  }
 0x102   : > { %5147 = vst [vmem:[#allocation53_spill] sm:$0xff] %v4134_v8  ;;  %5148 = vst [vmem:[#allocation54_spill] sm:$0xff] %v4137_v15  ;;  %v4153_v25 = vmul.f32 %v572_v47, %v509_v37  ;;  %v4155_v58 = vmul.f32 %v578_v39, %v505_v42  ;;  %v4157_v2 = vmul.f32 %v576_v57, %v503_v45  ;;  %839 = vmatprep.mubr.f32.mxu1 %v739_v62  ;;  %v3327_v39 = vld [vmem:[%s5034_s1 + $0x14] ss:$24 sps:$4 sm:$0xff]   ;;  %v3325_v45 = vld [vmem:[%s5034_s1 + $0x10] ss:$24 sps:$4 sm:$0xff]  }
 0x103   : > { %5149 = vst [vmem:[#allocation55_spill] sm:$0xff] %v4139_v51  ;;  %5150 = vst [vmem:[#allocation56_spill] sm:$0xff] %v4148_v16  ;;  %v4159_v10 = vmul.f32 %v582_v36, %v509_v37  ;;  %v4161_v53 = vmul.f32 %v580_v40, %v507_v43  ;;  %840 = vmatmul.mubr.f32.gmra.mxu1 %v738_v60  ;;  %596 = vmatprep.subr.bf16.mxu0 %v3324_v55  ;;  %v5157_v34 = vmov 0  }
 0x104   : > { %5151 = vst [vmem:[#allocation57_spill] sm:$0xff] %v4151_v49  ;;  %5152 = vst [vmem:[#allocation58_spill] sm:$0xff] %v4153_v25  ;;  %597 = vmatpush1.bf16.msra.mxu0 %v3322_v33  ;;  %1107 = vmatprep.subr.mxu1 %v4189_v52 }
 0x105   : > { %5153 = vst [vmem:[#allocation59_spill] sm:$0xff] %v4155_v58  ;;  %5154 = vst [vmem:[#allocation60_spill] sm:$0xff] %v4157_v2  ;;  %598 = vmatprep.subr.bf16.mxu0 %v3327_v39 }
 0x106   : > { %5155 = vst [vmem:[#allocation61_spill] sm:$0xff] %v4159_v10  ;;  %5156 = vst [vmem:[#allocation62_spill] sm:$0xff] %v4161_v53 }
 0x108   : > { %599 = vmatpush1.bf16.msra.mxu0 %v3325_v45 }
 0x109   : > { %960 = vmatprep.subr.mxu0 %v4189_v52 }
 0x10b   : > { %2865 = vmatmul.mubr.msk.bf16.vlgmr.msra.gmra.mxu0 %vm425_vm0, %v3692_v12  ;;  %v4195_v12 = vld [vmem:[%s5039_s6] sm:$0xff] }
 0x10c   : > { %626 = vmatprep.mubr.bf16.mxu0 %v5157_v34  ;;  %1108 = vmatpush1.msra.mxu1 %v4195_v12 }
 0x10d   : > { %961 = vmatpush1.msra.mxu0 %v4195_v12  ;;  %3017 = vmatprep.subr.mxu1 %v3690_v11 }
 0x113   : > { %2866 = vmatmul.mubr.msk.bf16.gmra.mxu0 %vm425_vm0, %v3730_v20  ;;  %v5064_v20 = vmov 0.0  }
 0x114   : > { %636 = vmatprep.mubr.bf16.mxu0 %v5157_v34  ;;  %1141 = vmatprep.mubr.f32.mxu1 %v5064_v20 }
 0x11b   : > { %2867 = vmatmul.mubr.msk.bf16.gmra.mxu0 %vm425_vm0, %v3781_v30 }
 0x11c   : > { %646 = vmatprep.mubr.bf16.mxu0 %v5157_v34 }
 0x123   : > { %2868 = vmatmul.mubr.msk.bf16.gmra.mxu0 %vm425_vm0, %v3822_v38 }
 0x124   : > { %994 = vmatprep.mubr.f32.mxu0 %v5064_v20 }
 0x1a6   : > { %v2971_v30 = vpop.f32.mrf.mxu1 }
 0x1a8   : > { %v2972_v38 = vpop.f32.mrf.mxu1 }
 0x1a9   : > { %v2973_v36 = vadd.f32 %v2972_v38, %v2971_v30 }
 0x1aa   : > { %v2974_v48 = vpop.f32.mrf.mxu1 }
 0x1ab   : > { %v846_v45 = vsel %vm845_vm1, %v2973_v36, -inf }
 0x1ac   : > { %v2975_v47 = vpop.f32.mrf.mxu1 }
 0x1ad   : > { %v2976_v53 = vadd.f32 %v2975_v47, %v2974_v48 }
 0x1ae   : > { %v2977_v57 = vpop.f32.mrf.mxu1 }
 0x1b0   : > { %v2978_v50 = vpop.f32.mrf.mxu1 }
 0x1b1   : > { %v2979_v62 = vadd.f32 %v2978_v50, %v2977_v57 }
 0x1b2   : > { %v2980_v56 = vpop.f32.mrf.mxu1 }
 0x1b3   : > { %v847_v10 = vsel %vm845_vm1, %v2979_v62, -inf }
 0x1b4   : > { %v2981_v42 = vpop.f32.mrf.mxu1 }
 0x1b5   : > { %v2982_v2 = vadd.f32 %v2981_v42, %v2980_v56 }
 0x1b6   : > { %v2983_v43 = vpop.f32.mrf.mxu1 }
 0x1b8   : > { %v2984_v40 = vpop.f32.mrf.mxu1 }
 0x1b9   : > { %v2985_v37 = vadd.f32 %v2984_v40, %v2983_v43  ;;  %v853_v40 = vsel %vm845_vm1, %v2976_v53, -inf }
 0x1bb   : > { %v2986_v44 = vpop.f32.mrf.mxu1  ;;  %v848_v33 = vsel %vm845_vm1, %v2985_v37, -inf }
 0x1bc   : > { %v849_v51 = vmax.f32 %v846_v45, %v848_v33 }
 0x1bd   : > { %v2987_v9 = vpop.f32.mrf.mxu1 }
 0x1be   : > { %v2988_v34 = vadd.f32 %v2987_v9, %v2986_v44 }
 0x1bf   : > { %v2989_v60 = vpop.f32.mrf.mxu1 }
 0x1c0   : > { %v855_v57 = vsel %vm845_vm1, %v2988_v34, -inf }
 0x1c1   : > { %v2990_v55 = vpop.f32.mrf.mxu1  ;;  %v856_v56 = vmax.f32 %v853_v40, %v855_v57 }
 0x1c2   : > { %v2991_v39 = vadd.f32 %v2990_v55, %v2989_v60  ;;  %v854_v60 = vsel %vm845_vm1, %v2982_v2, -inf }
 0x1c3   : > { %v2992_v20 = vpop.f32.mrf.mxu1 }
 0x1c4   : > { %v850_v58 = vsel %vm845_vm1, %v2991_v39, -inf }
 0x1c5   : > { %v851_v43 = vmax.f32 %v847_v10, %v850_v58  ;;  %v2993_v30 = vpop.f32.mrf.mxu1 }
 0x1c6   : > { %v2994_v38 = vadd.f32 %v2993_v30, %v2992_v20 }
 0x1c7   : > { %v852_v50 = vmax.f32 %v849_v51, %v851_v43 }
 0x1c8   : > { %v857_v44 = vsel %vm845_vm1, %v2994_v38, -inf }
 0x1c9   : > { %v860_v9 = vsub.f32 %v2973_v36, %v852_v50  ;;  %v862_v48 = vsub.f32 %v2979_v62, %v852_v50  ;;  %v864_v47 = vsub.f32 %v2985_v37, %v852_v50  ;;  %v866_v55 = vsub.f32 %v2991_v39, %v852_v50 }
 0x1ca   : > { %v858_v42 = vmax.f32 %v854_v60, %v857_v44 }
 0x1cb   : > { %v868_v25 = vmul.f32 1.442695, %v860_v9  ;;  %v872_v33 = vmul.f32 1.442695, %v862_v48  ;;  %v876_v58 = vmul.f32 1.442695, %v864_v47 }
 0x1cc   : > { %v880_v10 = vmul.f32 1.442695, %v866_v55  ;;  %v859_v20 = vmax.f32 %v856_v56, %v858_v42 }
 0x1cd   : > { %3344 = vpow2.f32 %v868_v25 }
 0x1ce   : > { %3346 = vpow2.f32 %v872_v33  ;;  %v861_v51 = vsub.f32 %v2976_v53, %v859_v20  ;;  %v863_v45 = vsub.f32 %v2982_v2, %v859_v20  ;;  %v865_v43 = vsub.f32 %v2988_v34, %v859_v20 }
 0x1cf   : > { %3348 = vpow2.f32 %v876_v58  ;;  %v867_v30 = vsub.f32 %v2994_v38, %v859_v20  ;;  %v5158_v53 = vmov 0.0  }
 0x1d0   : > { %3350 = vpow2.f32 %v880_v10  ;;  %v870_v4 = vmul.f32 1.442695, %v861_v51  ;;  %v874_v36 = vmul.f32 1.442695, %v863_v45  ;;  %v878_v62 = vmul.f32 1.442695, %v865_v43 }
 0x1d1   : > { %v882_v37 = vmul.f32 1.442695, %v867_v30 }
 0x1d2   : > { %3352 = vpow2.f32 %v870_v4 }
 0x1d3   : > { %3354 = vpow2.f32 %v874_v36 }
 0x1d4   : > { %3356 = vpow2.f32 %v878_v62 }
 0x1d5   : > { %3358 = vpow2.f32 %v882_v37 }
 0x1da   : > { %v3345_v39 = vpop.eup %3344 }
 0x1db   : > { %v3347_v57 = vpop.eup %3346  ;;  %v884_v50 = vsel %vm845_vm1, %v3345_v39, 0.0  ;;  %2869 = vmatmul.mubr.msk.f32.vlgmr.msra.gmra.mxu0 %vm845_vm1, %v3345_v39 }
 0x1dc   : > { %v3349_v25 = vpop.eup %3348  ;;  %v885_v2 = vsel %vm845_vm1, %v3347_v57, 0.0  ;;  %1000 = vmatprep.mubr.f32.mxu0 %v5158_v53 }
 0x1dd   : > { %v3351_v34 = vpop.eup %3350  ;;  %v886_v38 = vadd.f32 %v885_v2, %v884_v50  ;;  %v887_v40 = vsel %vm845_vm1, %v3349_v25, 0.0  ;;  %v5174_v50 = vld [vmem:[#allocation20_spill] sm:$0xff] }
 0x1de   : > { %v889_v9 = vsel %vm845_vm1, %v3351_v34, 0.0  ;;  %v5176_v2 = vld [vmem:[#allocation24_spill] sm:$0xff] }
 0x1df   : > { %v3353_v60 = vpop.eup %3352  ;;  %v888_v4 = vadd.f32 %v887_v40, %v886_v38  ;;  %v5178_v38 = vld [vmem:[#allocation27_spill] sm:$0xff]  ;;  %v5179_v40 = vld [vmem:[#allocation26_spill] sm:$0xff] }
 0x1e0   : > { %v3355_v44 = vpop.eup %3354  ;;  %2870 = vmatmul.mubr.msk.f32.gmra.mxu0 %vm845_vm1, %v3353_v60  ;;  %v891_v48 = vsel %vm845_vm1, %v3353_v60, 0.0  ;;  %v5180_v60 = vld [vmem:[#allocation25_spill] sm:$0xff] }
 0x1e1   : > { %v3357_v47 = vpop.eup %3356  ;;  %v890_v55 = vadd.f32 %v889_v9, %v888_v4  ;;  %1006 = vmatprep.mubr.f32.mxu0 %v5158_v53  ;;  %v892_v56 = vsel %vm845_vm1, %v3355_v44, 0.0  ;;  %v5181_v4 = vld [vmem:[#allocation30_spill] sm:$0xff]  ;;  %v5183_v9 = vld [vmem:[#allocation35_spill] sm:$0xff] }
 0x1e2   : > { %v3359_v42 = vpop.eup %3358  ;;  %v893_v33 = vadd.f32 %v892_v56, %v891_v48  ;;  %v894_v58 = vsel %vm845_vm1, %v3357_v47, 0.0  ;;  %v4283_v48 = vld [vmem:[%s5036_s3 + $0x78] sm:$0xff]   ;;  %v4297_v56 = vld [vmem:[%s5036_s3 + $0x70] sm:$0xff]  }
 0x1e3   : > { %3360 = vrcp.f32 %v890_v55  ;;  %v896_v20 = vsel %vm845_vm1, %v3359_v42, 0.0  ;;  %2995 = vmatprep.subr.bf16.mxu0 %v4283_v48 }
 0x1e4   : > { %2871 = vmatmul.mubr.msk.f32.gmra.mxu0 %vm845_vm1, %v3347_v57  ;;  %v895_v10 = vadd.f32 %v894_v58, %v893_v33  ;;  %v5186_v33 = vld [vmem:[#allocation39_spill] sm:$0xff]  ;;  %v4311_v58 = vld [vmem:[%s5036_s3 + $0x68] sm:$0xff]  }
 0x1e5   : > { %1012 = vmatprep.mubr.f32.mxu0 %v5158_v53 }
 0x1e6   : > { %v897_v51 = vadd.f32 %v896_v20, %v895_v10  ;;  %v4316_v10 = vld [vmem:[%s5036_s3 + $0x28] sm:$0xff]   ;;  %v4330_v20 = vld [vmem:[%s5036_s3 + $0x20] sm:$0xff]  }
 0x1e8   : > { %2872 = vmatmul.mubr.msk.f32.gmra.mxu0 %vm845_vm1, %v3355_v44  ;;  %3362 = vrcp.f32 %v897_v51  ;;  %v5182_v44 = vld [vmem:[#allocation28_spill] sm:$0xff] }
 0x1e9   : > { %1018 = vmatprep.mubr.f32.mxu0 %v5158_v53 }
 0x1ec   : > { %2873 = vmatmul.mubr.msk.f32.gmra.mxu0 %vm845_vm1, %v3349_v25  ;;  %v5175_v25 = vld [vmem:[#allocation21_spill] sm:$0xff] }
 0x1ed   : > { %1024 = vmatprep.mubr.f32.mxu0 %v5158_v53 }
 0x1f0   : > { %v3361_v45 = vpop.eup %3360  ;;  %2874 = vmatmul.mubr.msk.f32.gmra.mxu0 %vm845_vm1, %v3357_v47  ;;  %v5184_v47 = vld [vmem:[#allocation32_spill] sm:$0xff] }
 0x1f1   : > { %1030 = vmatprep.mubr.f32.mxu0 %v5158_v53  ;;  %v900_v43 = vmul.f32 %v3361_v45, %v890_v55  ;;  %v5185_v55 = vld [vmem:[#allocation43_spill] sm:$0xff] }
 0x1f3   : > { %v902_v30 = vsub.f32 2.0, %v900_v43  ;;  %v4368_v43 = vld [vmem:[%s5036_s3 + $0x8] sm:$0xff]  }
 0x1f4   : > { %2875 = vmatmul.mubr.msk.f32.gmra.mxu0 %vm845_vm1, %v3351_v34  ;;  %v5177_v34 = vld [vmem:[#allocation29_spill] sm:$0xff] }
 0x1f5   : > { %v3363_v36 = vpop.eup %3362  ;;  %1036 = vmatprep.mubr.f32.mxu0 %v5158_v53  ;;  %v904_v62 = vmul.f32 %v3361_v45, %v902_v30  ;;  %v4363_v45 = vld [vmem:[%s5036_s3 + $0x48] sm:$0xff]   ;;  %v4375_v30 = vld [vmem:[%s5036_s3 + $0x40] sm:$0xff]  }
 0x1f6   : > { %v901_v37 = vmul.f32 %v3363_v36, %v897_v51  ;;  %v4356_v51 = vld [vmem:[%s5036_s3 + $0x10] sm:$0xff]  }
 0x1f7   : > { %2877 = vmatmul.mubr.msk.f32.vlgmr.msra.gmra.mxu1 %vm845_vm1, %v904_v62  ;;  %v618_v62 = vpop.f32.mrf.mxu0 }
 0x1f8   : > { %3018 = vmatpush3.msra.mxu1 %v3698_v13  ;;  %2876 = vmatmul.mubr.msk.f32.gmra.mxu0 %vm845_vm1, %v3359_v42  ;;  %v903_v39 = vsub.f32 2.0, %v901_v37  ;;  %v5159_v13 = vld [vmem:[#allocation5_spill] sm:$0xff]  ;;  %v4302_v42 = vld [vmem:[%s5036_s3 + $0x30] sm:$0xff]  }
 0x1f9   : > { %3019 = vmatprep.subr.mxu1 %v3707_v14  ;;  %1147 = vmatprep.mubr.f32.mxu1 %v5158_v53  ;;  %v5160_v14 = vld [vmem:[#allocation6_spill] sm:$0xff]  ;;  %v620_v37 = vpop.f32.mrf.mxu0 }
 0x1fa   : > { %3020 = vmatpush3.msra.mxu1 %v3716_v17  ;;  %v905_v57 = vmul.f32 %v3363_v36, %v903_v39  ;;  %v5161_v17 = vld [vmem:[#allocation7_spill] sm:$0xff]  ;;  %v4380_v36 = vld [vmem:[%s5036_s3] sm:$0xff]  }
 0x1fb   : > { %3021 = vmatprep.subr.mxu1 %v3722_v18  ;;  %v5162_v18 = vld [vmem:[#allocation8_spill] sm:$0xff]  ;;  %v622_v39 = vpop.f32.mrf.mxu0 }
 0x1fc   : > { %2878 = vmatmul.mubr.msk.f32.gmra.mxu1 %vm845_vm1, %v905_v57 }
 0x1fd   : > { %3022 = vmatpush3.msra.mxu1 %v3728_v19  ;;  %1385 = vmatprep.mubr.f32.mxu1 %v4001_v6  ;;  %v5163_v19 = vld [vmem:[#allocation9_spill] sm:$0xff]  ;;  %v5173_v6 = vld [vmem:[#allocation19_spill] sm:$0xff]  ;;  %v624_v57 = vpop.f32.mrf.mxu0 }
 0x1fe   : > { %3023 = vmatprep.subr.mxu1 %v3736_v21  ;;  %v5164_v21 = vld [vmem:[#allocation10_spill] sm:$0xff] }
 0x1ff   : > { %3024 = vmatpush3.msra.mxu1 %v3742_v22  ;;  %v5165_v22 = vld [vmem:[#allocation11_spill] sm:$0xff] }
 0x200   : > { %3025 = vmatprep.subr.mxu1 %v3748_v23  ;;  %v5166_v23 = vld [vmem:[#allocation12_spill] sm:$0xff] }
 0x201   : > { %3026 = vmatpush3.msra.mxu1 %v3756_v26  ;;  %v5167_v26 = vld [vmem:[#allocation13_spill] sm:$0xff] }
 0x202   : > { %3027 = vmatprep.subr.mxu1 %v3765_v27  ;;  %v5168_v27 = vld [vmem:[#allocation14_spill] sm:$0xff] }
 0x203   : > { %3028 = vmatpush3.msra.mxu1 %v3772_v28  ;;  %v5169_v28 = vld [vmem:[#allocation15_spill] sm:$0xff] }
 0x204   : > { %3029 = vmatprep.subr.mxu1 %v3778_v29  ;;  %v5170_v29 = vld [vmem:[#allocation16_spill] sm:$0xff] }
 0x205   : > { %3030 = vmatpush3.msra.mxu1 %v3788_v31  ;;  %v5171_v31 = vld [vmem:[#allocation17_spill] sm:$0xff] }
 0x206   : > { %3031 = vmatprep.subr.mxu1 %v3794_v32  ;;  %v5172_v32 = vld [vmem:[#allocation18_spill] sm:$0xff] }
 0x207   : > { %3032 = vmatpush3.msra.mxu1 %v5159_v13  ;;  %v628_v13 = vpop.f32.mrf.mxu0 }
 0x208   : > { %3033 = vmatprep.subr.mxu1 %v5160_v14 }
 0x209   : > { %3034 = vmatpush3.msra.mxu1 %v5161_v17  ;;  %v630_v14 = vpop.f32.mrf.mxu0 }
 0x20a   : > { %3035 = vmatprep.subr.mxu1 %v5162_v18 }
 0x20b   : > { %3036 = vmatpush3.msra.mxu1 %v5163_v19  ;;  %v632_v17 = vpop.f32.mrf.mxu0 }
 0x20c   : > { %3037 = vmatprep.subr.mxu1 %v5164_v21 }
 0x20d   : > { %3038 = vmatpush3.msra.mxu1 %v5165_v22  ;;  %v634_v18 = vpop.f32.mrf.mxu0 }
 0x20e   : > { %3039 = vmatprep.subr.mxu1 %v5166_v23 }
 0x20f   : > { %3040 = vmatpush3.msra.mxu1 %v5167_v26  ;;  %v638_v19 = vpop.f32.mrf.mxu0 }
 0x210   : > { %3041 = vmatprep.subr.mxu1 %v5168_v27 }
 0x211   : > { %3042 = vmatpush3.msra.mxu1 %v5169_v28  ;;  %v640_v21 = vpop.f32.mrf.mxu0 }
 0x212   : > { %3043 = vmatprep.subr.mxu1 %v5170_v29 }
 0x213   : > { %3044 = vmatpush3.msra.mxu1 %v5171_v31  ;;  %v642_v22 = vpop.f32.mrf.mxu0 }
 0x214   : > { %3045 = vmatprep.subr.mxu1 %v5172_v32 }
 0x215   : > { %3046 = vmatpush3.msra.mxu1 %v5173_v6  ;;  %v644_v23 = vpop.f32.mrf.mxu0 }
 0x216   : > { %3047 = vmatprep.subr.mxu1 %v5174_v50 }
 0x217   : > { %3048 = vmatpush3.msra.mxu1 %v5175_v25  ;;  %v648_v26 = vpop.f32.mrf.mxu0 }
 0x218   : > { %1386 = vmatmul.mubr.f32.vlgmr.msra.gmra.mxu1 %v5176_v2  ;;  %1687 = vmatprep.subr.mxu1 %v4189_v52 }
 0x219   : > { %1390 = vmatprep.mubr.f32.mxu1 %v5177_v34  ;;  %1688 = vmatpush1.msra.mxu1 %v4195_v12  ;;  %v650_v27 = vpop.f32.mrf.mxu0  ;;  %v5187_v34 = vld [vmem:[#allocation22_spill] sm:$0xff] }
 0x21a   : > { %3095 = vmatprep.subr.mxu1 %v3690_v11  ;;  %v4288_v11 = vld [vmem:[%s5036_s3 + $0x38] sm:$0xff]  }
 0x21b   : > { %2996 = vmatpush3.bf16.msra.mxu0 %v4288_v11  ;;  %v652_v28 = vpop.f32.mrf.mxu0 }
 0x21c   : > { %1391 = vmatmul.mubr.f32.gmra.mxu1 %v5178_v38  ;;  %2997 = vmatprep.subr.bf16.mxu0 %v4297_v56  ;;  %v357_v38 = vsub.s32 5, %v5187_v34 }
 0x21d   : > { %1395 = vmatprep.mubr.f32.mxu1 %v5179_v40  ;;  %v654_v29 = vpop.f32.mrf.mxu0 }
 0x21f   : > { %2998 = vmatpush3.bf16.msra.mxu0 %v4302_v42 }
 0x220   : > { %1396 = vmatmul.mubr.f32.gmra.mxu1 %v5180_v60  ;;  %2999 = vmatprep.subr.bf16.mxu0 %v4311_v58  ;;  %v353_v60 = vsub.s32 4, %v5187_v34 }
 0x221   : > { %1400 = vmatprep.mubr.f32.mxu1 %v5181_v4 }
 0x223   : > { %3000 = vmatpush3.bf16.msra.mxu0 %v4316_v10 }
 0x224   : > { %1401 = vmatmul.mubr.f32.gmra.mxu1 %v5182_v44  ;;  %v5188_v44 = vld [vmem:[#allocation23_spill] sm:$0xff] }
 0x225   : > { %1405 = vmatprep.mubr.f32.mxu1 %v5183_v9  ;;  %v358_v9 = vrot.slane %v5188_v44, %v357_v38 }
 0x227   : > { %v4389_v1 = vadd.f32 %v630_v14, %v358_v9  ;;  %v4393_v49 = vadd.f32 %v620_v37, %v358_v9  ;;  %v4399_v16 = vadd.f32 %v634_v18, %v358_v9  ;;  %v4401_v34 = vadd.f32 %v640_v21, %v358_v9 }
 0x228   : > { %1406 = vmatmul.mubr.f32.gmra.mxu1 %v5184_v47  ;;  %v4411_v37 = vadd.f32 %v644_v23, %v358_v9 }
 0x229   : > { %1410 = vmatprep.mubr.f32.mxu1 %v5185_v55  ;;  %v354_v55 = vrot.slane %v5188_v44, %v353_v60  ;;  %5189 = vst [vmem:[#allocation5_spill] sm:$0xff] %v4389_v1  ;;  %5191 = vst [vmem:[#allocation7_spill] sm:$0xff] %v4393_v49  ;;  %v4407_v60 = vadd.f32 %v624_v57, %v358_v9 }
 0x22a   : > { %5194 = vst [vmem:[#allocation10_spill] sm:$0xff] %v4399_v16  ;;  %5195 = vst [vmem:[#allocation11_spill] sm:$0xff] %v4401_v34 }
 0x22b   : > { %v4391_v15 = vadd.f32 %v632_v17, %v354_v55  ;;  %v4395_v46 = vadd.f32 %v628_v13, %v354_v55  ;;  %v4397_v8 = vadd.f32 %v622_v39, %v354_v55  ;;  %v4403_v38 = vadd.f32 %v642_v22, %v354_v55  ;;  %5198 = vst [vmem:[#allocation14_spill] sm:$0xff] %v4407_v60 }
 0x22c   : > { %1411 = vmatmul.mubr.f32.gmra.mxu1 %v5186_v33  ;;  %v4405_v54 = vadd.f32 %v618_v62, %v354_v55  ;;  %v4409_v14 = vadd.f32 %v638_v19, %v354_v55  ;;  %v4413_v13 = vadd.f32 %v650_v27, %v358_v9  ;;  %v4417_v44 = vadd.f32 %v648_v26, %v354_v55 }
 0x22d   : > { %1415 = vmatprep.mubr.f32.mxu1 %v4113_v3  ;;  %v4325_v3 = vld [vmem:[%s5036_s3 + $0x60] sm:$0xff]   ;;  %5190 = vst [vmem:[#allocation6_spill] sm:$0xff] %v4391_v15  ;;  %5192 = vst [vmem:[#allocation8_spill] sm:$0xff] %v4395_v46  ;;  %v4419_v21 = vadd.f32 %v652_v28, %v354_v55 }
 0x22e   : > { %3001 = vmatprep.subr.bf16.mxu0 %v4325_v3  ;;  %5193 = vst [vmem:[#allocation9_spill] sm:$0xff] %v4397_v8  ;;  %5196 = vst [vmem:[#allocation12_spill] sm:$0xff] %v4403_v38 }
 0x22f   : > { %3002 = vmatpush3.bf16.msra.mxu0 %v4330_v20  ;;  %5197 = vst [vmem:[#allocation13_spill] sm:$0xff] %v4405_v54  ;;  %5199 = vst [vmem:[#allocation15_spill] sm:$0xff] %v4409_v14 }
 0x230   : > { %1416 = vmatmul.mubr.f32.gmra.mxu1 %v4100_v41  ;;  %v4338_v41 = vld [vmem:[%s5036_s3 + $0x58] sm:$0xff]   ;;  %5200 = vst [vmem:[#allocation16_spill] sm:$0xff] %v4417_v44 }
 0x231   : > { %1420 = vmatprep.mubr.f32.mxu1 %v4143_v63  ;;  %v4343_v63 = vld [vmem:[%s5036_s3 + $0x18] sm:$0xff]   ;;  %3003 = vmatprep.subr.bf16.mxu0 %v4338_v41 }
 0x233   : > { %3004 = vmatpush3.bf16.msra.mxu0 %v4343_v63 }
 0x234   : > { %1421 = vmatmul.mubr.f32.gmra.mxu1 %v4129_v61  ;;  %v4351_v61 = vld [vmem:[%s5036_s3 + $0x50] sm:$0xff]  }
 0x235   : > { %1721 = vmatprep.mubr.f32.mxu1 %v5158_v53  ;;  %3005 = vmatprep.subr.bf16.mxu0 %v4351_v61 }
 0x237   : > { %3006 = vmatpush3.bf16.msra.mxu0 %v4356_v51 }
 0x238   : > { %3007 = vmatprep.subr.bf16.mxu0 %v4363_v45 }
 0x23b   : > { %3008 = vmatpush3.bf16.msra.mxu0 %v4368_v43 }
 0x23c   : > { %3009 = vmatprep.subr.bf16.mxu0 %v4375_v30 }
 0x23f   : > { %3010 = vmatpush3.bf16.msra.mxu0 %v4380_v36 }
 0x240   : > { %1540 = vmatprep.subr.mxu0 %v4189_v52 }
 0x29b   : > { %v996_v31 = vpop.f32.mrf.mxu0 }
 0x29c   : > { %v1043_v26 = vmul.f32 %v996_v31, %v4405_v54 }
 0x29d   : > { %v998_v32 = vpop.f32.mrf.mxu0 }
 0x29e   : > { %v1044_v62 = vmul.f32 %v998_v32, %v4393_v49 }
 0x2a0   : > { %v1002_v6 = vpop.f32.mrf.mxu0 }
 0x2a1   : > { %v1045_v19 = vmul.f32 %v1002_v6, %v4397_v8 }
 0x2a2   : > { %v1004_v50 = vpop.f32.mrf.mxu0 }
 0x2a3   : > { %v1046_v28 = vmul.f32 %v1004_v50, %v4407_v60 }
 0x2a4   : > { %v1008_v25 = vpop.f32.mrf.mxu0 }
 0x2a5   : > { %v1047_v57 = vmul.f32 %v1008_v25, %v4395_v46 }
 0x2a6   : > { %v1010_v2 = vpop.f32.mrf.mxu0 }
 0x2a7   : > { %v1048_v39 = vmul.f32 %v1010_v2, %v4389_v1  ;;  %v4427_v2 = vadd.f32 %v654_v29, %v358_v9 }
 0x2a8   : > { %v1014_v40 = vpop.f32.mrf.mxu0 }
 0x2a9   : > { %v1049_v18 = vmul.f32 %v1014_v40, %v4391_v15  ;;  %v1062_v55 = vadd.f32 %v1048_v39, %v1044_v62 }
 0x2aa   : > { %v1016_v4 = vpop.f32.mrf.mxu0 }
 0x2ab   : > { %v1050_v23 = vmul.f32 %v1016_v4, %v4399_v16  ;;  %v1065_v25 = vadd.f32 %v1049_v18, %v1045_v19  ;;  %v1059_v16 = vadd.f32 %v1047_v57, %v1043_v26 }
 0x2ac   : > { %v1020_v47 = vpop.f32.mrf.mxu0 }
 0x2ad   : > { %v1051_v40 = vmul.f32 %v1020_v47, %v4409_v14  ;;  %v1068_v29 = vadd.f32 %v1050_v23, %v1046_v28 }
 0x2ae   : > { %v1022_v33 = vpop.f32.mrf.mxu0 }
 0x2af   : > { %v1052_v27 = vmul.f32 %v1022_v33, %v4401_v34  ;;  %v1060_v60 = vadd.f32 %v1059_v16, %v1051_v40 }
 0x2b0   : > { %v1026_v0 = vpop.f32.mrf.mxu0 }
 0x2b1   : > { %v1053_v7 = vmul.f32 %v1026_v0, %v4403_v38  ;;  %v1063_v9 = vadd.f32 %v1062_v55, %v1052_v27 }
 0x2b2   : > { %v1028_v17 = vpop.f32.mrf.mxu0 }
 0x2b3   : > { %v1054_v46 = vmul.f32 %v1028_v17, %v4411_v37  ;;  %v1066_v38 = vadd.f32 %v1065_v25, %v1053_v7 }
 0x2b4   : > { %v1032_v22 = vpop.f32.mrf.mxu0 }
 0x2b5   : > { %v1055_v33 = vmul.f32 %v1032_v22, %v4417_v44  ;;  %v1069_v14 = vadd.f32 %v1068_v29, %v1054_v46 }
 0x2b6   : > { %v1034_v32 = vpop.f32.mrf.mxu0 }
 0x2b7   : > { %v1056_v6 = vmul.f32 %v1034_v32, %v4413_v13  ;;  %v1143_v4 = vpop.f32.mrf.mxu1  ;;  %v1061_v62 = vadd.f32 %v1060_v60, %v1055_v33 }
 0x2b8   : > { %v1038_v0 = vpop.f32.mrf.mxu0 }
 0x2b9   : > { %v1057_v31 = vmul.f32 %v1038_v0, %v4419_v21  ;;  %v1145_v50 = vpop.f32.mrf.mxu1  ;;  %v1064_v39 = vadd.f32 %v1063_v9, %v1056_v6  ;;  %v1154_v23 = vmul.f32 %v1143_v4, %v1061_v62 }
 0x2ba   : > { %v1040_v47 = vpop.f32.mrf.mxu0 }
 0x2bb   : > { %v1058_v18 = vmul.f32 %v1040_v47, %v4427_v2  ;;  %v1067_v17 = vadd.f32 %v1066_v38, %v1057_v31  ;;  %v1155_v22 = vmul.f32 %v1145_v50, %v1064_v39 }
 0x2bc   : > { %v1149_v19 = vpop.f32.mrf.mxu1 }
 0x2bd   : > { %v1070_v32 = vadd.f32 %v1069_v14, %v1058_v18  ;;  %v1156_v57 = vmul.f32 %v1149_v19, %v1067_v17 }
 0x2be   : > { %v1151_v26 = vpop.f32.mrf.mxu1 }
 0x2bf   : > { %v1157_v44 = vmul.f32 %v1151_v26, %v1070_v32  ;;  %v1158_v7 = vpack.c.bf16 %v1156_v57, %v1154_v23 }
 0x2c1   : > { %v1159_v27 = vpack.c.bf16 %v1157_v44, %v1155_v22 }
 0x2c3   : > { %1294 = vmatprep.mubr.bf16.mxu0 %v1159_v27 }
 0x2c4   : > { %1295 = vmatmul.mubr.bf16.vlgmr.msra.gmra.mxu0 %v1158_v7 }
 0x2c5   : > { %1541 = vmatpush1.msra.mxu0 %v4195_v12  ;;  %1574 = vmatprep.mubr.f32.mxu0 %v5158_v53 }
 0x2c6   : > { %3073 = vmatprep.subr.bf16.mxu0 %v4283_v48 }
 0x2d8   : > { %v3049_v46 = vpop.f32.mrf.mxu1 }
 0x2da   : > { %v3050_v16 = vpop.f32.mrf.mxu1 }
 0x2db   : > { %v3051_v0 = vadd.f32 %v3050_v16, %v3049_v46 }
 0x2dc   : > { %v3052_v38 = vpop.f32.mrf.mxu1 }
 0x2dd   : > { %v1426_v47 = vsel %vm845_vm1, %v3051_v0, -inf }
 0x2de   : > { %v3053_v60 = vpop.f32.mrf.mxu1 }
 0x2df   : > { %v3054_v17 = vadd.f32 %v3053_v60, %v3052_v38 }
 0x2e0   : > { %v3055_v14 = vpop.f32.mrf.mxu1 }
 0x2e1   : > { %v1433_v46 = vsel %vm845_vm1, %v3054_v17, -inf }
 0x2e2   : > { %v3056_v28 = vpop.f32.mrf.mxu1 }
 0x2e3   : > { %v3057_v12 = vadd.f32 %v3056_v28, %v3055_v14 }
 0x2e4   : > { %v3058_v40 = vpop.f32.mrf.mxu1 }
 0x2e5   : > { %v1427_v62 = vsel %vm845_vm1, %v3057_v12, -inf }
 0x2e6   : > { %v3059_v55 = vpop.f32.mrf.mxu1 }
 0x2e7   : > { %v3060_v19 = vadd.f32 %v3059_v55, %v3058_v40 }
 0x2e8   : > { %v3061_v25 = vpop.f32.mrf.mxu1 }
 0x2e9   : > { %v1434_v16 = vsel %vm845_vm1, %v3060_v19, -inf }
 0x2ea   : > { %v3062_v6 = vpop.f32.mrf.mxu1 }
 0x2eb   : > { %v3063_v33 = vadd.f32 %v3062_v6, %v3061_v25 }
 0x2ec   : > { %v3064_v44 = vpop.f32.mrf.mxu1 }
 0x2ed   : > { %v1428_v31 = vsel %vm845_vm1, %v3063_v33, -inf }
 0x2ee   : > { %v3065_v4 = vpop.f32.mrf.mxu1  ;;  %v1429_v57 = vmax.f32 %v1426_v47, %v1428_v31 }
 0x2ef   : > { %v3066_v39 = vadd.f32 %v3065_v4, %v3064_v44 }
 0x2f0   : > { %v3067_v29 = vpop.f32.mrf.mxu1 }
 0x2f1   : > { %v1435_v27 = vsel %vm845_vm1, %v3066_v39, -inf }
 0x2f2   : > { %v3068_v9 = vpop.f32.mrf.mxu1  ;;  %v1436_v40 = vmax.f32 %v1433_v46, %v1435_v27 }
 0x2f3   : > { %v3069_v50 = vadd.f32 %v3068_v9, %v3067_v29 }
 0x2f4   : > { %v3070_v18 = vpop.f32.mrf.mxu1 }
 0x2f5   : > { %v1430_v32 = vsel %vm845_vm1, %v3069_v50, -inf }
 0x2f6   : > { %v1431_v26 = vmax.f32 %v1427_v62, %v1430_v32  ;;  %v3071_v22 = vpop.f32.mrf.mxu1 }
 0x2f7   : > { %v3072_v23 = vadd.f32 %v3071_v22, %v3070_v18 }
 0x2f8   : > { %v1432_v7 = vmax.f32 %v1429_v57, %v1431_v26 }
 0x2f9   : > { %v1437_v14 = vsel %vm845_vm1, %v3072_v23, -inf }
 0x2fa   : > { %v1440_v28 = vsub.f32 %v3051_v0, %v1432_v7  ;;  %v1442_v38 = vsub.f32 %v3057_v12, %v1432_v7  ;;  %v1444_v60 = vsub.f32 %v3063_v33, %v1432_v7  ;;  %v1446_v25 = vsub.f32 %v3069_v50, %v1432_v7 }
 0x2fb   : > { %v1438_v55 = vmax.f32 %v1434_v16, %v1437_v14 }
 0x2fc   : > { %v1448_v6 = vmul.f32 1.442695, %v1440_v28  ;;  %v1452_v44 = vmul.f32 1.442695, %v1442_v38  ;;  %v1456_v4 = vmul.f32 1.442695, %v1444_v60 }
 0x2fd   : > { %v1460_v29 = vmul.f32 1.442695, %v1446_v25  ;;  %v1439_v9 = vmax.f32 %v1436_v40, %v1438_v55 }
 0x2fe   : > { %3364 = vpow2.f32 %v1448_v6 }
 0x2ff   : > { %3366 = vpow2.f32 %v1452_v44  ;;  %v1441_v31 = vsub.f32 %v3054_v17, %v1439_v9  ;;  %v1443_v47 = vsub.f32 %v3060_v19, %v1439_v9  ;;  %v1445_v18 = vsub.f32 %v3066_v39, %v1439_v9 }
 0x300   : > { %3368 = vpow2.f32 %v1456_v4  ;;  %v1447_v62 = vsub.f32 %v3072_v23, %v1439_v9 }
 0x301   : > { %3370 = vpow2.f32 %v1460_v29  ;;  %v1450_v32 = vmul.f32 1.442695, %v1441_v31  ;;  %v1454_v0 = vmul.f32 1.442695, %v1443_v47  ;;  %v1458_v12 = vmul.f32 1.442695, %v1445_v18 }
 0x302   : > { %v1462_v33 = vmul.f32 1.442695, %v1447_v62 }
 0x303   : > { %3372 = vpow2.f32 %v1450_v32  ;;  %v4488_v32 = vld [vmem:[%s5038_s5 + $0x78] sm:$0xff] }
 0x304   : > { %3374 = vpow2.f32 %v1454_v0 }
 0x305   : > { %3376 = vpow2.f32 %v1458_v12  ;;  %v4495_v12 = vld [vmem:[%s5038_s5 + $0xf0] sm:$0xff] }
 0x306   : > { %3378 = vpow2.f32 %v1462_v33  ;;  %v4502_v33 = vld [vmem:[%s5038_s5 + $0x70] sm:$0xff] }
 0x30b   : > { %v3365_v50 = vpop.eup %3364 }
 0x30c   : > { %v3367_v57 = vpop.eup %3366  ;;  %v1464_v26 = vsel %vm845_vm1, %v3365_v50, 0.0  ;;  %2896 = vmatmul.mubr.msk.f32.vlgmr.msra.gmra.mxu0 %vm845_vm1, %v3365_v50 }
 0x30d   : > { %v3369_v17 = vpop.eup %3368  ;;  %v1465_v39 = vsel %vm845_vm1, %v3367_v57, 0.0  ;;  %1580 = vmatprep.mubr.f32.mxu0 %v5158_v53  ;;  %3074 = vmatpush3.bf16.msra.mxu0 %v4288_v11 }
 0x30e   : > { %v3371_v19 = vpop.eup %3370  ;;  %v1466_v22 = vadd.f32 %v1465_v39, %v1464_v26  ;;  %3075 = vmatprep.subr.bf16.mxu0 %v4297_v56  ;;  %v1467_v23 = vsel %vm845_vm1, %v3369_v17, 0.0  ;;  %v4517_v26 = vld [vmem:[%s5038_s5 + $0x68] sm:$0xff]  ;;  %v4524_v39 = vld [vmem:[%s5038_s5 + $0xe0] sm:$0xff] }
 0x30f   : > { %v1469_v16 = vsel %vm845_vm1, %v3371_v19, 0.0 }
 0x310   : > { %v3373_v27 = vpop.eup %3372  ;;  %v1468_v7 = vadd.f32 %v1467_v23, %v1466_v22  ;;  %v4536_v22 = vld [vmem:[%s5038_s5 + $0xd8] sm:$0xff] }
 0x311   : > { %v3375_v46 = vpop.eup %3374  ;;  %2897 = vmatmul.mubr.msk.f32.gmra.mxu0 %vm845_vm1, %v3373_v27  ;;  %v1471_v14 = vsel %vm845_vm1, %v3373_v27, 0.0  ;;  %v4542_v23 = vld [vmem:[%s5038_s5 + $0x58] sm:$0xff]  ;;  %v4548_v27 = vld [vmem:[%s5038_s5 + $0xd0] sm:$0xff] }
 0x312   : > { %v3377_v28 = vpop.eup %3376  ;;  %v1470_v38 = vadd.f32 %v1469_v16, %v1468_v7  ;;  %1586 = vmatprep.mubr.f32.mxu0 %v5158_v53  ;;  %v1472_v60 = vsel %vm845_vm1, %v3375_v46, 0.0  ;;  %3076 = vmatpush3.bf16.msra.mxu0 %v4302_v42  ;;  %v4554_v7 = vld [vmem:[%s5038_s5 + $0x50] sm:$0xff]  ;;  %v4566_v16 = vld [vmem:[%s5038_s5 + $0x48] sm:$0xff] }
 0x313   : > { %v3379_v25 = vpop.eup %3378  ;;  %v1473_v40 = vadd.f32 %v1472_v60, %v1471_v14  ;;  %3077 = vmatprep.subr.bf16.mxu0 %v4311_v58  ;;  %v1474_v55 = vsel %vm845_vm1, %v3377_v28, 0.0  ;;  %v4572_v14 = vld [vmem:[%s5038_s5 + $0xc0] sm:$0xff]  ;;  %v4590_v60 = vld [vmem:[%s5038_s5 + $0x38] sm:$0xff] }
 0x314   : > { %3380 = vrcp.f32 %v1470_v38  ;;  %v1476_v44 = vsel %vm845_vm1, %v3379_v25, 0.0 }
 0x315   : > { %2898 = vmatmul.mubr.msk.f32.gmra.mxu0 %vm845_vm1, %v3367_v57  ;;  %v1475_v6 = vadd.f32 %v1474_v55, %v1473_v40  ;;  %v4509_v57 = vld [vmem:[%s5038_s5 + $0xe8] sm:$0xff]  ;;  %v4602_v40 = vld [vmem:[%s5038_s5 + $0x30] sm:$0xff] }
 0x316   : > { %1592 = vmatprep.mubr.f32.mxu0 %v5158_v53  ;;  %3078 = vmatpush3.bf16.msra.mxu0 %v4316_v10  ;;  %v4608_v55 = vld [vmem:[%s5038_s5 + $0xa8] sm:$0xff] }
 0x317   : > { %v1477_v4 = vadd.f32 %v1476_v44, %v1475_v6  ;;  %3079 = vmatprep.subr.bf16.mxu0 %v4325_v3  ;;  %v4614_v6 = vld [vmem:[%s5038_s5 + $0x28] sm:$0xff]  ;;  %v4620_v44 = vld [vmem:[%s5038_s5 + $0xa0] sm:$0xff] }
 0x319   : > { %2899 = vmatmul.mubr.msk.f32.gmra.mxu0 %vm845_vm1, %v3375_v46  ;;  %3382 = vrcp.f32 %v1477_v4  ;;  %v4560_v46 = vld [vmem:[%s5038_s5 + $0xc8] sm:$0xff] }
 0x31a   : > { %1598 = vmatprep.mubr.f32.mxu0 %v5158_v53  ;;  %3080 = vmatpush3.bf16.msra.mxu0 %v4330_v20 }
 0x31b   : > { %3081 = vmatprep.subr.bf16.mxu0 %v4338_v41 }
 0x31d   : > { %2900 = vmatmul.mubr.msk.f32.gmra.mxu0 %vm845_vm1, %v3369_v17  ;;  %v5201_v17 = vld [vmem:[#allocation36_spill] sm:$0xff] }
 0x31e   : > { %1604 = vmatprep.mubr.f32.mxu0 %v5158_v53  ;;  %3082 = vmatpush3.bf16.msra.mxu0 %v4343_v63 }
 0x31f   : > { %3083 = vmatprep.subr.bf16.mxu0 %v4351_v61 }
 0x321   : > { %v3381_v29 = vpop.eup %3380  ;;  %2901 = vmatmul.mubr.msk.f32.gmra.mxu0 %vm845_vm1, %v3377_v28  ;;  %v4578_v28 = vld [vmem:[%s5038_s5 + $0x40] sm:$0xff] }
 0x322   : > { %1610 = vmatprep.mubr.f32.mxu0 %v5158_v53  ;;  %v1480_v9 = vmul.f32 %v3381_v29, %v1470_v38  ;;  %3084 = vmatpush3.bf16.msra.mxu0 %v4356_v51  ;;  %v4584_v38 = vld [vmem:[%s5038_s5 + $0xb8] sm:$0xff] }
 0x323   : > { %3085 = vmatprep.subr.bf16.mxu0 %v4363_v45 }
 0x324   : > { %v1482_v31 = vsub.f32 2.0, %v1480_v9  ;;  %v4638_v9 = vld [vmem:[%s5038_s5 + $0x18] sm:$0xff] }
 0x325   : > { %2902 = vmatmul.mubr.msk.f32.gmra.mxu0 %vm845_vm1, %v3371_v19  ;;  %v4530_v19 = vld [vmem:[%s5038_s5 + $0x60] sm:$0xff] }
 0x326   : > { %v3383_v47 = vpop.eup %3382  ;;  %1616 = vmatprep.mubr.f32.mxu0 %v5158_v53  ;;  %v1484_v18 = vmul.f32 %v3381_v29, %v1482_v31  ;;  %3086 = vmatpush3.bf16.msra.mxu0 %v4368_v43  ;;  %v4632_v29 = vld [vmem:[%s5038_s5 + $0x98] sm:$0xff]  ;;  %v4644_v31 = vld [vmem:[%s5038_s5 + $0x90] sm:$0xff] }
 0x327   : > { %v1481_v62 = vmul.f32 %v3383_v47, %v1477_v4  ;;  %3087 = vmatprep.subr.bf16.mxu0 %v4375_v30  ;;  %v4626_v4 = vld [vmem:[%s5038_s5 + $0x20] sm:$0xff] }
 0x328   : > { %2904 = vmatmul.mubr.msk.f32.vlgmr.msra.gmra.mxu1 %vm845_vm1, %v1484_v18  ;;  %v4656_v18 = vld [vmem:[%s5038_s5 + $0x88] sm:$0xff] }
 0x329   : > { %3096 = vmatpush3.msra.mxu1 %v4488_v32  ;;  %2903 = vmatmul.mubr.msk.f32.gmra.mxu0 %vm845_vm1, %v3379_v25  ;;  %v1483_v0 = vsub.f32 2.0, %v1481_v62  ;;  %v4596_v25 = vld [vmem:[%s5038_s5 + $0xb0] sm:$0xff]  ;;  %5203 = vst [vmem:[#allocation18_spill] sm:$0xff] %v4656_v18  ;;  %v4662_v62 = vld [vmem:[%s5038_s5 + $0x8] sm:$0xff] }
 0x32a   : > { %3097 = vmatprep.subr.mxu1 %v4495_v12  ;;  %1727 = vmatprep.mubr.f32.mxu1 %v5158_v53  ;;  %5204 = vst [vmem:[#allocation19_spill] sm:$0xff] %v4662_v62 }
 0x32b   : > { %3098 = vmatpush3.msra.mxu1 %v4502_v33  ;;  %v1485_v50 = vmul.f32 %v3383_v47, %v1483_v0  ;;  %3088 = vmatpush3.bf16.msra.mxu0 %v4380_v36  ;;  %v4650_v47 = vld [vmem:[%s5038_s5 + $0x10] sm:$0xff]  ;;  %v4668_v0 = vld [vmem:[%s5038_s5 + $0x80] sm:$0xff] }
 0x32c   : > { %3099 = vmatprep.subr.mxu1 %v4509_v57  ;;  %2019 = vmatprep.subr.mxu0 %v4189_v52  ;;  %5202 = vst [vmem:[#allocation17_spill] sm:$0xff] %v4650_v47  ;;  %5205 = vst [vmem:[#allocation20_spill] sm:$0xff] %v4668_v0 }
 0x32d   : > { %2905 = vmatmul.mubr.msk.f32.gmra.mxu1 %vm845_vm1, %v1485_v50  ;;  %v4674_v50 = vld [vmem:[%s5038_s5] sm:$0xff] }
 0x32e   : > { %3100 = vmatpush3.msra.mxu1 %v4517_v26  ;;  %1864 = vmatprep.mubr.f32.mxu1 %v5201_v17  ;;  %5206 = vst [vmem:[#allocation21_spill] sm:$0xff] %v4674_v50  ;;  %v5207_v17 = vld [vmem:[#allocation31_spill] sm:$0xff] }
 0x32f   : > { %3101 = vmatprep.subr.mxu1 %v4524_v39 }
 0x330   : > { %3102 = vmatpush3.msra.mxu1 %v4530_v19 }
 0x331   : > { %3103 = vmatprep.subr.mxu1 %v4536_v22 }
 0x332   : > { %3104 = vmatpush3.msra.mxu1 %v4542_v23 }
 0x333   : > { %3105 = vmatprep.subr.mxu1 %v4548_v27 }
 0x334   : > { %3106 = vmatpush3.msra.mxu1 %v4554_v7 }
 0x335   : > { %3107 = vmatprep.subr.mxu1 %v4560_v46 }
 0x336   : > { %3108 = vmatpush3.msra.mxu1 %v4566_v16 }
 0x337   : > { %3109 = vmatprep.subr.mxu1 %v4572_v14 }
 0x338   : > { %3110 = vmatpush3.msra.mxu1 %v4578_v28 }
 0x339   : > { %3111 = vmatprep.subr.mxu1 %v4584_v38 }
 0x33a   : > { %3112 = vmatpush3.msra.mxu1 %v4590_v60 }
 0x33b   : > { %3113 = vmatprep.subr.mxu1 %v4596_v25 }
 0x33c   : > { %3114 = vmatpush3.msra.mxu1 %v4602_v40 }
 0x33d   : > { %3115 = vmatprep.subr.mxu1 %v4608_v55 }
 0x33e   : > { %3116 = vmatpush3.msra.mxu1 %v4614_v6 }
 0x33f   : > { %3117 = vmatprep.subr.mxu1 %v4620_v44 }
 0x340   : > { %3118 = vmatpush3.msra.mxu1 %v4626_v4 }
 0x341   : > { %3119 = vmatprep.subr.mxu1 %v4632_v29 }
 0x342   : > { %3120 = vmatpush3.msra.mxu1 %v4638_v9 }
 0x343   : > { %3121 = vmatprep.subr.mxu1 %v4644_v31 }
 0x344   : > { %3122 = vmatpush3.msra.mxu1 %v4650_v47  ;;  %v5211_v47 = vld [vmem:[#allocation33_spill] sm:$0xff] }
 0x345   : > { %3123 = vmatprep.subr.mxu1 %v4656_v18  ;;  %v5208_v18 = vld [vmem:[#allocation44_spill] sm:$0xff] }
 0x346   : > { %3124 = vmatpush3.msra.mxu1 %v4662_v62  ;;  %v5209_v62 = vld [vmem:[#allocation40_spill] sm:$0xff] }
 0x347   : > { %3125 = vmatprep.subr.mxu1 %v4668_v0  ;;  %v5210_v0 = vld [vmem:[#allocation37_spill] sm:$0xff] }
 0x348   : > { %3126 = vmatpush3.msra.mxu1 %v4674_v50 }
 0x349   : > { %1865 = vmatmul.mubr.f32.vlgmr.msra.gmra.mxu1 %v5207_v17  ;;  %3151 = vmatprep.subr.bf16.mxu1 %v4283_v48  ;;  %v5212_v48 = vld [vmem:[#allocation41_spill] sm:$0xff] }
 0x34a   : > { %1869 = vmatprep.mubr.f32.mxu1 %v5208_v18  ;;  %3152 = vmatpush3.bf16.msra.mxu1 %v4288_v11  ;;  %v5213_v11 = vld [vmem:[#allocation38_spill] sm:$0xff] }
 0x34b   : > { %3153 = vmatprep.subr.bf16.mxu1 %v4297_v56  ;;  %v5214_v56 = vld [vmem:[#allocation34_spill] sm:$0xff] }
 0x34d   : > { %1870 = vmatmul.mubr.f32.gmra.mxu1 %v5209_v62 }
 0x34e   : > { %1874 = vmatprep.mubr.f32.mxu1 %v5210_v0  ;;  %3154 = vmatpush3.bf16.msra.mxu1 %v4302_v42  ;;  %v5215_v42 = vld [vmem:[#allocation45_spill] sm:$0xff] }
 0x34f   : > { %3155 = vmatprep.subr.bf16.mxu1 %v4311_v58  ;;  %v5217_v58 = vld [vmem:[#allocation52_spill] sm:$0xff] }
 0x351   : > { %1875 = vmatmul.mubr.f32.gmra.mxu1 %v5211_v47 }
 0x352   : > { %1879 = vmatprep.mubr.f32.mxu1 %v4089_v5  ;;  %3156 = vmatpush3.bf16.msra.mxu1 %v4316_v10  ;;  %v5216_v5 = vld [vmem:[#allocation42_spill] sm:$0xff] }
 0x353   : > { %3157 = vmatprep.subr.bf16.mxu1 %v4325_v3 }
 0x355   : > { %1880 = vmatmul.mubr.f32.gmra.mxu1 %v5212_v48 }
 0x356   : > { %1884 = vmatprep.mubr.f32.mxu1 %v5213_v11  ;;  %3158 = vmatpush3.bf16.msra.mxu1 %v4330_v20 }
 0x357   : > { %3159 = vmatprep.subr.bf16.mxu1 %v4338_v41 }
 0x359   : > { %1885 = vmatmul.mubr.f32.gmra.mxu1 %v5214_v56 }
 0x35a   : > { %1889 = vmatprep.mubr.f32.mxu1 %v5215_v42  ;;  %3160 = vmatpush3.bf16.msra.mxu1 %v4343_v63 }
 0x35b   : > { %3161 = vmatprep.subr.bf16.mxu1 %v4351_v61 }
 0x35d   : > { %1890 = vmatmul.mubr.f32.gmra.mxu1 %v5216_v5  ;;  %v5219_v5 = vld [vmem:[#allocation8_spill] sm:$0xff] }
 0x35e   : > { %1894 = vmatprep.mubr.f32.mxu1 %v4115_v59  ;;  %3162 = vmatpush3.bf16.msra.mxu1 %v4356_v51 }
 0x35f   : > { %3163 = vmatprep.subr.bf16.mxu1 %v4363_v45 }
 0x361   : > { %1895 = vmatmul.mubr.f32.gmra.mxu1 %v4102_v35  ;;  %v4715_v35 = vld [vmem:[%s5037_s4] ss:$0 sm:$0xff] }
 0x362   : > { %1899 = vmatprep.mubr.f32.mxu1 %v4145_v24  ;;  %3164 = vmatpush3.bf16.msra.mxu1 %v4368_v43  ;;  %5218 = vst [vmem:[#allocation24_spill] sm:$0xff] %v4715_v35 }
 0x363   : > { %3165 = vmatprep.subr.bf16.mxu1 %v4375_v30 }
 0x365   : > { %1900 = vmatmul.mubr.f32.gmra.mxu1 %v5217_v58 }
 0x366   : > { %3166 = vmatpush3.bf16.msra.mxu1 %v4380_v36 }
 0x367   : > { %2498 = vmatprep.subr.mxu1 %v4189_v52 }
 0x384   : > { %v3011_v59 = vpop.f32.mrf.mxu0 }
 0x386   : > { %v3012_v24 = vpop.f32.mrf.mxu0 }
 0x387   : > { %v3013_v10 = vadd.f32 %v3012_v24, %v3011_v59 }
 0x388   : > { %v3014_v3 = vpop.f32.mrf.mxu0 }
 0x389   : > { %v1297_v20 = vadd.f32 %v3013_v10, %v4715_v35  ;;  %v5220_v10 = vld [vmem:[#allocation10_spill] sm:$0xff] }
 0x38a   : > { %v3015_v41 = vpop.f32.mrf.mxu0 }
 0x38b   : > { %1303 = vst.msk [vmem:[%s4718_s18] sm:$0xff] %vm425_vm0, %v1297_v20  ;;  %v3016_v52 = vadd.f32 %v3015_v41, %v3014_v3  ;;  %v5221_v41 = vld [vmem:[#allocation12_spill] sm:$0xff] }
 0x38d   : > { %v1300_v63 = vadd.f32 %v3016_v52, %v4715_v35  ;;  %v5222_v35 = vld [vmem:[#allocation14_spill] sm:$0xff] }
 0x38f   : > { %1304 = vst.msk [vmem:[%s4718_s18 + $0x8] sm:$0xff] %vm425_vm0, %v1300_v63 }
 0x3cc   : > { %v1576_v61 = vpop.f32.mrf.mxu0 }
 0x3cd   : > { %v1623_v63 = vmul.f32 %v1576_v61, %v4405_v54 }
 0x3ce   : > { %v1578_v51 = vpop.f32.mrf.mxu0 }
 0x3cf   : > { %v1624_v42 = vmul.f32 %v1578_v51, %v4393_v49 }
 0x3d1   : > { %v1582_v45 = vpop.f32.mrf.mxu0 }
 0x3d2   : > { %v1625_v24 = vmul.f32 %v1582_v45, %v4397_v8 }
 0x3d3   : > { %v1584_v43 = vpop.f32.mrf.mxu0 }
 0x3d4   : > { %v1626_v50 = vmul.f32 %v1584_v43, %v5222_v35 }
 0x3d5   : > { %v1588_v30 = vpop.f32.mrf.mxu0 }
 0x3d6   : > { %v1627_v58 = vmul.f32 %v1588_v30, %v5219_v5 }
 0x3d7   : > { %v1590_v36 = vpop.f32.mrf.mxu0 }
 0x3d8   : > { %v1628_v11 = vmul.f32 %v1590_v36, %v4389_v1  ;;  %v5223_v36 = vld [vmem:[#allocation15_spill] sm:$0xff]  ;;  %v1639_v5 = vadd.f32 %v1627_v58, %v1623_v63 }
 0x3d9   : > { %v1594_v47 = vpop.f32.mrf.mxu0 }
 0x3da   : > { %v1629_v56 = vmul.f32 %v1594_v47, %v4391_v15  ;;  %v1642_v15 = vadd.f32 %v1628_v11, %v1624_v42 }
 0x3db   : > { %v1596_v18 = vpop.f32.mrf.mxu0 }
 0x3dc   : > { %v1630_v3 = vmul.f32 %v1596_v18, %v5220_v10  ;;  %v1645_v51 = vadd.f32 %v1629_v56, %v1625_v24  ;;  %v5224_v18 = vld [vmem:[#allocation16_spill] sm:$0xff] }
 0x3dd   : > { %v1600_v62 = vpop.f32.mrf.mxu0 }
 0x3de   : > { %v1631_v1 = vmul.f32 %v1600_v62, %v5223_v36 }
 0x3df   : > { %v1602_v0 = vpop.f32.mrf.mxu0 }
 0x3e0   : > { %v1632_v20 = vmul.f32 %v1602_v0, %v4401_v34  ;;  %v1648_v34 = vadd.f32 %v1630_v3, %v1626_v50  ;;  %v1640_v54 = vadd.f32 %v1639_v5, %v1631_v1  ;;  %v4744_v1 = vld [vmem:[%s5039_s6] sm:$0xff] }
 0x3e1   : > { %v1606_v17 = vpop.f32.mrf.mxu0 }
 0x3e2   : > { %v1633_v52 = vmul.f32 %v1606_v17, %v5221_v41  ;;  %v1643_v17 = vadd.f32 %v1642_v15, %v1632_v20 }
 0x3e3   : > { %v1608_v48 = vpop.f32.mrf.mxu0 }
 0x3e4   : > { %v1634_v30 = vmul.f32 %v1608_v48, %v4411_v37  ;;  %v1646_v41 = vadd.f32 %v1645_v51, %v1633_v52 }
 0x3e5   : > { %v1612_v59 = vpop.f32.mrf.mxu0 }
 0x3e6   : > { %v1635_v8 = vmul.f32 %v1612_v59, %v5224_v18  ;;  %v1649_v36 = vadd.f32 %v1648_v34, %v1634_v30 }
 0x3e7   : > { %v1614_v47 = vpop.f32.mrf.mxu0 }
 0x3e8   : > { %v1636_v49 = vmul.f32 %v1614_v47, %v4413_v13  ;;  %v1723_v45 = vpop.f32.mrf.mxu1  ;;  %v1641_v42 = vadd.f32 %v1640_v54, %v1635_v8  ;;  %v4751_v54 = vld [vmem:[%s5039_s6 + $0x8] sm:$0xff] }
 0x3e9   : > { %v1618_v0 = vpop.f32.mrf.mxu0 }
 0x3ea   : > { %v1637_v61 = vmul.f32 %v1618_v0, %v4419_v21  ;;  %v1725_v43 = vpop.f32.mrf.mxu1  ;;  %v1644_v11 = vadd.f32 %v1643_v17, %v1636_v49  ;;  %v1734_v50 = vmul.f32 %v1723_v45, %v1641_v42 }
 0x3eb   : > { %v1620_v62 = vpop.f32.mrf.mxu0 }
 0x3ec   : > { %v1638_v56 = vmul.f32 %v1620_v62, %v4427_v2  ;;  %v1647_v48 = vadd.f32 %v1646_v41, %v1637_v61  ;;  %v1735_v59 = vmul.f32 %v1725_v43, %v1644_v11 }
 0x3ed   : > { %v1729_v24 = vpop.f32.mrf.mxu1 }
 0x3ee   : > { %v1650_v47 = vadd.f32 %v1649_v36, %v1638_v56  ;;  %v1736_v58 = vmul.f32 %v1729_v24, %v1647_v48 }
 0x3ef   : > { %v1731_v63 = vpop.f32.mrf.mxu1 }
 0x3f0   : > { %v1737_v18 = vmul.f32 %v1731_v63, %v1650_v47  ;;  %v1738_v3 = vpack.c.bf16 %v1736_v58, %v1734_v50 }
 0x3f2   : > { %v1739_v15 = vpack.c.bf16 %v1737_v18, %v1735_v59 }
 0x3f4   : > { %1772 = vmatprep.mubr.bf16.mxu0 %v1739_v15 }
 0x3f5   : > { %1773 = vmatmul.mubr.bf16.vlgmr.msra.gmra.mxu0 %v1738_v3 }
 0x3f6   : > { %2020 = vmatpush1.msra.mxu0 %v4744_v1  ;;  %2053 = vmatprep.mubr.f32.mxu0 %v5158_v53 }
 0x3f7   : > { %2166 = vmatprep.subr.mxu0 %v4751_v54 }
 0x409   : > { %v3127_v8 = vpop.f32.mrf.mxu1 }
 0x40b   : > { %v3128_v49 = vpop.f32.mrf.mxu1 }
 0x40c   : > { %v3129_v17 = vadd.f32 %v3128_v49, %v3127_v8 }
 0x40d   : > { %v3130_v34 = vpop.f32.mrf.mxu1 }
 0x40e   : > { %v1905_v48 = vsel %vm845_vm1, %v3129_v17, -inf }
 0x40f   : > { %v3131_v5 = vpop.f32.mrf.mxu1 }
 0x410   : > { %v3132_v47 = vadd.f32 %v3131_v5, %v3130_v34 }
 0x411   : > { %v3133_v20 = vpop.f32.mrf.mxu1 }
 0x413   : > { %v3134_v41 = vpop.f32.mrf.mxu1 }
 0x414   : > { %v3135_v43 = vadd.f32 %v3134_v41, %v3133_v20  ;;  %v1912_v41 = vsel %vm845_vm1, %v3132_v47, -inf }
 0x415   : > { %v3136_v52 = vpop.f32.mrf.mxu1 }
 0x416   : > { %v1906_v58 = vsel %vm845_vm1, %v3135_v43, -inf }
 0x417   : > { %v3137_v36 = vpop.f32.mrf.mxu1 }
 0x418   : > { %v3138_v63 = vadd.f32 %v3137_v36, %v3136_v52 }
 0x419   : > { %v3139_v51 = vpop.f32.mrf.mxu1 }
 0x41b   : > { %v3140_v30 = vpop.f32.mrf.mxu1 }
 0x41c   : > { %v3141_v0 = vadd.f32 %v3140_v30, %v3139_v51  ;;  %v1913_v51 = vsel %vm845_vm1, %v3138_v63, -inf }
 0x41d   : > { %v3142_v45 = vpop.f32.mrf.mxu1 }
 0x41e   : > { %v1907_v11 = vsel %vm845_vm1, %v3141_v0, -inf }
 0x41f   : > { %v3143_v18 = vpop.f32.mrf.mxu1  ;;  %v1908_v50 = vmax.f32 %v1905_v48, %v1907_v11 }
 0x420   : > { %v3144_v42 = vadd.f32 %v3143_v18, %v3142_v45 }
 0x421   : > { %v3145_v61 = vpop.f32.mrf.mxu1 }
 0x422   : > { %v1914_v49 = vsel %vm845_vm1, %v3144_v42, -inf }
 0x423   : > { %v3146_v62 = vpop.f32.mrf.mxu1  ;;  %v1915_v52 = vmax.f32 %v1912_v41, %v1914_v49  ;;  %v3457_v41 = vld [vmem:[%s5038_s5 + $0xf8] sm:$0xff] }
 0x424   : > { %v3147_v56 = vadd.f32 %v3146_v62, %v3145_v61 }
 0x425   : > { %v3148_v24 = vpop.f32.mrf.mxu1 }
 0x426   : > { %v1909_v59 = vsel %vm845_vm1, %v3147_v56, -inf }
 0x427   : > { %v1910_v15 = vmax.f32 %v1906_v58, %v1909_v59  ;;  %v3149_v3 = vpop.f32.mrf.mxu1 }
 0x428   : > { %v3150_v8 = vadd.f32 %v3149_v3, %v3148_v24 }
 0x429   : > { %v1911_v20 = vmax.f32 %v1908_v50, %v1910_v15 }
 0x42a   : > { %v1916_v30 = vsel %vm845_vm1, %v3150_v8, -inf }
 0x42b   : > { %v1919_v45 = vsub.f32 %v3129_v17, %v1911_v20  ;;  %v1921_v34 = vsub.f32 %v3135_v43, %v1911_v20  ;;  %v1923_v5 = vsub.f32 %v3141_v0, %v1911_v20  ;;  %v1925_v18 = vsub.f32 %v3147_v56, %v1911_v20 }
 0x42c   : > { %v1917_v36 = vmax.f32 %v1913_v51, %v1916_v30 }
 0x42d   : > { %v1927_v61 = vmul.f32 1.442695, %v1919_v45  ;;  %v1931_v62 = vmul.f32 1.442695, %v1921_v34  ;;  %v1935_v11 = vmul.f32 1.442695, %v1923_v5 }
 0x42e   : > { %v1939_v48 = vmul.f32 1.442695, %v1925_v18  ;;  %v1918_v24 = vmax.f32 %v1915_v52, %v1917_v36 }
 0x42f   : > { %3384 = vpow2.f32 %v1927_v61 }
 0x430   : > { %3386 = vpow2.f32 %v1931_v62  ;;  %v1920_v58 = vsub.f32 %v3132_v47, %v1918_v24  ;;  %v1922_v59 = vsub.f32 %v3138_v63, %v1918_v24  ;;  %v1924_v50 = vsub.f32 %v3144_v42, %v1918_v24 }
 0x431   : > { %3388 = vpow2.f32 %v1935_v11  ;;  %v1926_v15 = vsub.f32 %v3150_v8, %v1918_v24 }
 0x432   : > { %3390 = vpow2.f32 %v1939_v48  ;;  %v1929_v3 = vmul.f32 1.442695, %v1920_v58  ;;  %v1933_v17 = vmul.f32 1.442695, %v1922_v59  ;;  %v1937_v43 = vmul.f32 1.442695, %v1924_v50 }
 0x433   : > { %v1941_v0 = vmul.f32 1.442695, %v1926_v15 }
 0x434   : > { %3392 = vpow2.f32 %v1929_v3 }
 0x435   : > { %3394 = vpow2.f32 %v1933_v17 }
 0x436   : > { %3396 = vpow2.f32 %v1937_v43 }
 0x437   : > { %3398 = vpow2.f32 %v1941_v0 }
 0x43c   : > { %v3385_v56 = vpop.eup %3384 }
 0x43d   : > { %v3387_v49 = vpop.eup %3386  ;;  %v1943_v20 = vsel %vm845_vm1, %v3385_v56, 0.0  ;;  %2908 = vmatmul.mubr.msk.f32.vlgmr.msra.gmra.mxu0 %vm845_vm1, %v3385_v56 }
 0x43e   : > { %v3389_v47 = vpop.eup %3388  ;;  %v1944_v42 = vsel %vm845_vm1, %v3387_v49, 0.0  ;;  %2167 = vmatpush1.msra.mxu0 %v4744_v1  ;;  %2059 = vmatprep.mubr.f32.mxu0 %v5158_v53 }
 0x43f   : > { %v3391_v63 = vpop.eup %3390  ;;  %v1945_v8 = vadd.f32 %v1944_v42, %v1943_v20  ;;  %3173 = vmatprep.subr.mxu0 %v3457_v41  ;;  %v1946_v51 = vsel %vm845_vm1, %v3389_v47, 0.0  ;;  %v5225_v20 = vld [vmem:[#allocation49_spill] sm:$0xff]  ;;  %v5242_v42 = vld [vmem:[#allocation59_spill] sm:$0xff]  ;;  %v5243_v41 = vld [vmem:[#allocation60_spill] sm:$0xff] }
 0x440   : > { %v1948_v5 = vsel %vm845_vm1, %v3391_v63, 0.0 }
 0x441   : > { %v3393_v30 = vpop.eup %3392  ;;  %v1947_v45 = vadd.f32 %v1946_v51, %v1945_v8  ;;  %v3470_v8 = vld [vmem:[%s5036_s3 + $0x48] sm:$0xff]   ;;  %v5244_v51 = vld [vmem:[#allocation61_spill] sm:$0xff] }
 0x442   : > { %v3395_v34 = vpop.eup %3394  ;;  %2909 = vmatmul.mubr.msk.f32.gmra.mxu0 %vm845_vm1, %v3393_v30  ;;  %v1950_v18 = vsel %vm845_vm1, %v3393_v30, 0.0  ;;  %v3471_v30 = vld [vmem:[%s5036_s3 + $0x8] sm:$0xff]  }
 0x443   : > { %v3397_v52 = vpop.eup %3396  ;;  %v1949_v36 = vadd.f32 %v1948_v5, %v1947_v45  ;;  %2065 = vmatprep.mubr.f32.mxu0 %v5158_v53  ;;  %v1951_v61 = vsel %vm845_vm1, %v3395_v34, 0.0  ;;  %v3472_v45 = vld [vmem:[%s5036_s3 + $0x40] sm:$0xff]  }
 0x444   : > { %v3399_v62 = vpop.eup %3398  ;;  %v1952_v11 = vadd.f32 %v1951_v61, %v1950_v18  ;;  %v1953_v48 = vsel %vm845_vm1, %v3397_v52, 0.0  ;;  %v3473_v5 = vld [vmem:[%s5036_s3] sm:$0xff]  }
 0x445   : > { %3400 = vrcp.f32 %v1949_v36  ;;  %v1955_v58 = vsel %vm845_vm1, %v3399_v62, 0.0 }
 0x446   : > { %2910 = vmatmul.mubr.msk.f32.gmra.mxu0 %vm845_vm1, %v3387_v49  ;;  %v1954_v24 = vadd.f32 %v1953_v48, %v1952_v11 }
 0x447   : > { %2071 = vmatprep.mubr.f32.mxu0 %v5158_v53 }
 0x448   : > { %v1956_v59 = vadd.f32 %v1955_v58, %v1954_v24 }
 0x44a   : > { %2911 = vmatmul.mubr.msk.f32.gmra.mxu0 %vm845_vm1, %v3395_v34  ;;  %3402 = vrcp.f32 %v1956_v59  ;;  %v5245_v34 = vld [vmem:[#allocation62_spill] sm:$0xff] }
 0x44b   : > { %2077 = vmatprep.mubr.f32.mxu0 %v5158_v53 }
 0x44e   : > { %2912 = vmatmul.mubr.msk.f32.gmra.mxu0 %vm845_vm1, %v3389_v47  ;;  %v5241_v47 = vld [vmem:[#allocation55_spill] sm:$0xff] }
 0x44f   : > { %2083 = vmatprep.mubr.f32.mxu0 %v5158_v53 }
 0x452   : > { %v3401_v50 = vpop.eup %3400  ;;  %2913 = vmatmul.mubr.msk.f32.gmra.mxu0 %vm845_vm1, %v3397_v52 }
 0x453   : > { %2089 = vmatprep.mubr.f32.mxu0 %v5158_v53  ;;  %v1959_v15 = vmul.f32 %v3401_v50, %v1949_v36 }
 0x455   : > { %v1961_v17 = vsub.f32 2.0, %v1959_v15 }
 0x456   : > { %2914 = vmatmul.mubr.msk.f32.gmra.mxu0 %vm845_vm1, %v3391_v63  ;;  %v3469_v63 = vld [vmem:[%s5036_s3 + $0x10] sm:$0xff]  }
 0x457   : > { %v3403_v3 = vpop.eup %3402  ;;  %2095 = vmatprep.mubr.f32.mxu0 %v5158_v53  ;;  %v1963_v0 = vmul.f32 %v3401_v50, %v1961_v17 }
 0x458   : > { %v1960_v43 = vmul.f32 %v3403_v3, %v1956_v59 }
 0x45a   : > { %2915 = vmatmul.mubr.msk.f32.gmra.mxu0 %vm845_vm1, %v3399_v62  ;;  %v1962_v56 = vsub.f32 2.0, %v1960_v43  ;;  %v5246_v62 = vld [vmem:[#allocation24_spill] sm:$0xff] }
 0x45b   : > { %2200 = vmatprep.mubr.f32.mxu0 %v5158_v53 }
 0x45c   : > { %v1964_v49 = vmul.f32 %v3403_v3, %v1962_v56 }
 0x45e   : > { %2916 = vmatmul.mubr.msk.f32.vlgmr.msra.gmra.mxu0 %vm845_vm1, %v1963_v0 }
 0x45f   : > { %3174 = vmatpush3.msra.mxu0 %v4488_v32  ;;  %2206 = vmatprep.mubr.f32.mxu0 %v5158_v53  ;;  %v5226_v32 = vld [vmem:[#allocation17_spill] sm:$0xff] }
 0x460   : > { %3175 = vmatprep.subr.mxu0 %v4495_v12  ;;  %v5227_v12 = vld [vmem:[#allocation18_spill] sm:$0xff] }
 0x461   : > { %3176 = vmatpush3.msra.mxu0 %v4502_v33  ;;  %v5228_v33 = vld [vmem:[#allocation19_spill] sm:$0xff] }
 0x462   : > { %3177 = vmatprep.subr.mxu0 %v4509_v57  ;;  %2917 = vmatmul.mubr.msk.f32.gmra.mxu0 %vm845_vm1, %v1964_v49  ;;  %v5229_v57 = vld [vmem:[#allocation20_spill] sm:$0xff] }
 0x463   : > { %3178 = vmatpush3.msra.mxu0 %v4517_v26  ;;  %2343 = vmatprep.mubr.f32.mxu0 %v5225_v20  ;;  %v5230_v26 = vld [vmem:[#allocation21_spill] sm:$0xff] }
 0x464   : > { %3179 = vmatprep.subr.mxu0 %v4524_v39  ;;  %v5231_v39 = vld [vmem:[#allocation46_spill] sm:$0xff] }
 0x465   : > { %3180 = vmatpush3.msra.mxu0 %v4530_v19  ;;  %v3458_v19 = vld [vmem:[%s5036_s3 + $0x78] sm:$0xff]  }
 0x466   : > { %3181 = vmatprep.subr.mxu0 %v4536_v22  ;;  %v5232_v22 = vld [vmem:[#allocation56_spill] sm:$0xff] }
 0x467   : > { %3182 = vmatpush3.msra.mxu0 %v4542_v23  ;;  %v3459_v23 = vld [vmem:[%s5036_s3 + $0x38] sm:$0xff]  }
 0x468   : > { %3183 = vmatprep.subr.mxu0 %v4548_v27  ;;  %v3460_v27 = vld [vmem:[%s5036_s3 + $0x70] sm:$0xff]  }
 0x469   : > { %3184 = vmatpush3.msra.mxu0 %v4554_v7  ;;  %v5233_v7 = vld [vmem:[#allocation53_spill] sm:$0xff] }
 0x46a   : > { %3185 = vmatprep.subr.mxu0 %v4560_v46  ;;  %v5234_v46 = vld [vmem:[#allocation50_spill] sm:$0xff] }
 0x46b   : > { %3186 = vmatpush3.msra.mxu0 %v4566_v16  ;;  %v3461_v16 = vld [vmem:[%s5036_s3 + $0x30] sm:$0xff]  }
 0x46c   : > { %3187 = vmatprep.subr.mxu0 %v4572_v14  ;;  %v3462_v14 = vld [vmem:[%s5036_s3 + $0x68] sm:$0xff]  }
 0x46d   : > { %3188 = vmatpush3.msra.mxu0 %v4578_v28  ;;  %v5235_v28 = vld [vmem:[#allocation47_spill] sm:$0xff] }
 0x46e   : > { %3189 = vmatprep.subr.mxu0 %v4584_v38  ;;  %v5236_v38 = vld [vmem:[#allocation57_spill] sm:$0xff] }
 0x46f   : > { %3190 = vmatpush3.msra.mxu0 %v4590_v60  ;;  %v3463_v60 = vld [vmem:[%s5036_s3 + $0x28] sm:$0xff]  }
 0x470   : > { %3191 = vmatprep.subr.mxu0 %v4596_v25  ;;  %v3464_v25 = vld [vmem:[%s5036_s3 + $0x60] sm:$0xff]  }
 0x471   : > { %3192 = vmatpush3.msra.mxu0 %v4602_v40  ;;  %v5237_v40 = vld [vmem:[#allocation54_spill] sm:$0xff] }
 0x472   : > { %3193 = vmatprep.subr.mxu0 %v4608_v55  ;;  %v5238_v55 = vld [vmem:[#allocation51_spill] sm:$0xff] }
 0x473   : > { %3194 = vmatpush3.msra.mxu0 %v4614_v6  ;;  %v3465_v6 = vld [vmem:[%s5036_s3 + $0x20] sm:$0xff]  }
 0x474   : > { %3195 = vmatprep.subr.mxu0 %v4620_v44  ;;  %v3466_v44 = vld [vmem:[%s5036_s3 + $0x58] sm:$0xff]  }
 0x475   : > { %3196 = vmatpush3.msra.mxu0 %v4626_v4  ;;  %v5239_v4 = vld [vmem:[#allocation48_spill] sm:$0xff] }
 0x476   : > { %3197 = vmatprep.subr.mxu0 %v4632_v29  ;;  %v5240_v29 = vld [vmem:[#allocation58_spill] sm:$0xff] }
 0x477   : > { %3198 = vmatpush3.msra.mxu0 %v4638_v9  ;;  %v3467_v9 = vld [vmem:[%s5036_s3 + $0x18] sm:$0xff]  }
 0x478   : > { %3199 = vmatprep.subr.mxu0 %v4644_v31  ;;  %v3468_v31 = vld [vmem:[%s5036_s3 + $0x50] sm:$0xff]  }
 0x479   : > { %3200 = vmatpush3.msra.mxu0 %v5226_v32 }
 0x47a   : > { %3201 = vmatprep.subr.mxu0 %v5227_v12 }
 0x47b   : > { %3202 = vmatpush3.msra.mxu0 %v5228_v33 }
 0x47c   : > { %3203 = vmatprep.subr.mxu0 %v5229_v57 }
 0x47d   : > { %3204 = vmatpush3.msra.mxu0 %v5230_v26  ;;  %v5247_v26 = vld [vmem:[#allocation6_spill] sm:$0xff] }
 0x47e   : > { %2344 = vmatmul.mubr.f32.vlgmr.msra.gmra.mxu0 %v5231_v39  ;;  %3229 = vmatprep.subr.bf16.mxu0 %v3458_v19 }
 0x47f   : > { %2348 = vmatprep.mubr.f32.mxu0 %v5232_v22  ;;  %3230 = vmatpush3.bf16.msra.mxu0 %v3459_v23  ;;  %v5248_v22 = vld [vmem:[#allocation5_spill] sm:$0xff] }
 0x480   : > { %3231 = vmatprep.subr.bf16.mxu0 %v3460_v27 }
 0x482   : > { %2349 = vmatmul.mubr.f32.gmra.mxu0 %v5233_v7  ;;  %v5249_v7 = vld [vmem:[#allocation9_spill] sm:$0xff] }
 0x483   : > { %2353 = vmatprep.mubr.f32.mxu0 %v5234_v46  ;;  %3232 = vmatpush3.bf16.msra.mxu0 %v3461_v16  ;;  %v5250_v16 = vld [vmem:[#allocation8_spill] sm:$0xff] }
 0x484   : > { %3233 = vmatprep.subr.bf16.mxu0 %v3462_v14 }
 0x486   : > { %2354 = vmatmul.mubr.f32.gmra.mxu0 %v5235_v28  ;;  %v5251_v28 = vld [vmem:[#allocation12_spill] sm:$0xff] }
 0x487   : > { %2358 = vmatprep.mubr.f32.mxu0 %v5236_v38  ;;  %3234 = vmatpush3.bf16.msra.mxu0 %v3463_v60 }
 0x488   : > { %3235 = vmatprep.subr.bf16.mxu0 %v3464_v25  ;;  %v5252_v25 = vld [vmem:[#allocation7_spill] sm:$0xff] }
 0x48a   : > { %2359 = vmatmul.mubr.f32.gmra.mxu0 %v5237_v40 }
 0x48b   : > { %2363 = vmatprep.mubr.f32.mxu0 %v5238_v55  ;;  %3236 = vmatpush3.bf16.msra.mxu0 %v3465_v6  ;;  %v5253_v6 = vld [vmem:[#allocation11_spill] sm:$0xff] }
 0x48c   : > { %3237 = vmatprep.subr.bf16.mxu0 %v3466_v44 }
 0x48e   : > { %2364 = vmatmul.mubr.f32.gmra.mxu0 %v5239_v4 }
 0x48f   : > { %2368 = vmatprep.mubr.f32.mxu0 %v5240_v29  ;;  %3238 = vmatpush3.bf16.msra.mxu0 %v3467_v9  ;;  %v5254_v29 = vld [vmem:[#allocation13_spill] sm:$0xff] }
 0x490   : > { %3239 = vmatprep.subr.bf16.mxu0 %v3468_v31 }
 0x492   : > { %2369 = vmatmul.mubr.f32.gmra.mxu0 %v5241_v47  ;;  %v5255_v47 = vld [vmem:[#allocation15_spill] sm:$0xff] }
 0x493   : > { %2373 = vmatprep.mubr.f32.mxu0 %v5242_v42  ;;  %3240 = vmatpush3.bf16.msra.mxu0 %v3469_v63 }
 0x494   : > { %3241 = vmatprep.subr.bf16.mxu0 %v3470_v8 }
 0x496   : > { %2374 = vmatmul.mubr.f32.gmra.mxu0 %v5243_v41 }
 0x497   : > { %2378 = vmatprep.mubr.f32.mxu0 %v5244_v51  ;;  %3242 = vmatpush3.bf16.msra.mxu0 %v3471_v30 }
 0x498   : > { %3243 = vmatprep.subr.bf16.mxu0 %v3472_v45 }
 0x49a   : > { %2379 = vmatmul.mubr.f32.gmra.mxu0 %v5245_v34 }
 0x49b   : > { %3244 = vmatpush3.bf16.msra.mxu0 %v3473_v5 }
 0x4b5   : > { %v3089_v18 = vpop.f32.mrf.mxu0 }
 0x4b7   : > { %v3090_v52 = vpop.f32.mrf.mxu0 }
 0x4b8   : > { %v3091_v36 = vadd.f32 %v3090_v52, %v3089_v18  ;;  %v5256_v18 = vld [vmem:[#allocation16_spill] sm:$0xff] }
 0x4b9   : > { %v3092_v61 = vpop.f32.mrf.mxu0 }
 0x4ba   : > { %v1775_v11 = vadd.f32 %v3091_v36, %v5246_v62 }
 0x4bb   : > { %v3093_v48 = vpop.f32.mrf.mxu0 }
 0x4bc   : > { %2906 = vst.msk [vmem:[%s4718_s18 + $0x10] sm:$0xff] %vm425_vm0, %v1775_v11  ;;  %v3094_v24 = vadd.f32 %v3093_v48, %v3092_v61 }
 0x4be   : > { %v1778_v58 = vadd.f32 %v3094_v24, %v5246_v62 }
 0x4c0   : > { %2907 = vst.msk [vmem:[%s4718_s18 + $0x18] sm:$0xff] %vm425_vm0, %v1778_v58 }
 0x4fd   : > { %v2055_v59 = vpop.f32.mrf.mxu0 }
 0x4fe   : > { %v2102_v9 = vmul.f32 %v2055_v59, %v5254_v29 }
 0x4ff   : > { %v2057_v50 = vpop.f32.mrf.mxu0 }
 0x500   : > { %v2103_v40 = vmul.f32 %v2057_v50, %v5252_v25 }
 0x502   : > { %v2061_v15 = vpop.f32.mrf.mxu0 }
 0x503   : > { %v2104_v46 = vmul.f32 %v2061_v15, %v5249_v7 }
 0x504   : > { %v2063_v3 = vpop.f32.mrf.mxu0 }
 0x505   : > { %v2105_v55 = vmul.f32 %v2063_v3, %v5222_v35 }
 0x506   : > { %v2067_v17 = vpop.f32.mrf.mxu0 }
 0x507   : > { %v2106_v14 = vmul.f32 %v2067_v17, %v5250_v16 }
 0x508   : > { %v2069_v43 = vpop.f32.mrf.mxu0 }
 0x509   : > { %v2107_v23 = vmul.f32 %v2069_v43, %v5248_v22  ;;  %v2118_v34 = vadd.f32 %v2106_v14, %v2102_v9 }
 0x50a   : > { %v2073_v0 = vpop.f32.mrf.mxu0 }
 0x50b   : > { %v2108_v39 = vmul.f32 %v2073_v0, %v5247_v26  ;;  %v2121_v41 = vadd.f32 %v2107_v23, %v2103_v40 }
 0x50c   : > { %v2075_v56 = vpop.f32.mrf.mxu0 }
 0x50d   : > { %v2109_v27 = vmul.f32 %v2075_v56, %v5220_v10  ;;  %v2124_v31 = vadd.f32 %v2108_v39, %v2104_v46 }
 0x50e   : > { %v2079_v49 = vpop.f32.mrf.mxu0 }
 0x50f   : > { %v2110_v42 = vmul.f32 %v2079_v49, %v5255_v47  ;;  %v2127_v51 = vadd.f32 %v2109_v27, %v2105_v55 }
 0x510   : > { %v2081_v20 = vpop.f32.mrf.mxu0 }
 0x511   : > { %v2111_v44 = vmul.f32 %v2081_v20, %v5253_v6  ;;  %v2119_v48 = vadd.f32 %v2118_v34, %v2110_v42 }
 0x512   : > { %v2085_v32 = vpop.f32.mrf.mxu0 }
 0x513   : > { %v2112_v38 = vmul.f32 %v2085_v32, %v5251_v28  ;;  %v2122_v61 = vadd.f32 %v2121_v41, %v2111_v44 }
 0x514   : > { %v2087_v12 = vpop.f32.mrf.mxu0 }
 0x515   : > { %v2113_v4 = vmul.f32 %v2087_v12, %v4411_v37  ;;  %v2125_v5 = vadd.f32 %v2124_v31, %v2112_v38 }
 0x516   : > { %v2091_v33 = vpop.f32.mrf.mxu0 }
 0x517   : > { %v2114_v52 = vmul.f32 %v2091_v33, %v5256_v18  ;;  %v2128_v11 = vadd.f32 %v2127_v51, %v2113_v4 }
 0x518   : > { %v2093_v57 = vpop.f32.mrf.mxu0 }
 0x519   : > { %v2115_v30 = vmul.f32 %v2093_v57, %v4413_v13  ;;  %v2120_v15 = vadd.f32 %v2119_v48, %v2114_v52 }
 0x51a   : > { %v2097_v19 = vpop.f32.mrf.mxu0 }
 0x51b   : > { %v2116_v63 = vmul.f32 %v2097_v19, %v4419_v21  ;;  %v2123_v59 = vadd.f32 %v2122_v61, %v2115_v30 }
 0x51c   : > { %v2099_v60 = vpop.f32.mrf.mxu0 }
 0x51d   : > { %v2117_v45 = vmul.f32 %v2099_v60, %v4427_v2  ;;  %v2126_v24 = vadd.f32 %v2125_v5, %v2116_v63 }
 0x51e   : > { %v2202_v8 = vpop.f32.mrf.mxu0 }
 0x51f   : > { %v2129_v50 = vadd.f32 %v2128_v11, %v2117_v45  ;;  %v2213_v56 = vmul.f32 %v2202_v8, %v2120_v15 }
 0x520   : > { %v2204_v36 = vpop.f32.mrf.mxu0 }
 0x521   : > { %v2214_v43 = vmul.f32 %v2204_v36, %v2123_v59 }
 0x522   : > { %v2208_v58 = vpop.f32.mrf.mxu0 }
 0x523   : > { %v2215_v3 = vmul.f32 %v2208_v58, %v2126_v24 }
 0x524   : > { %v2210_v17 = vpop.f32.mrf.mxu0 }
 0x525   : > { %v2216_v0 = vmul.f32 %v2210_v17, %v2129_v50  ;;  %v2217_v20 = vpack.c.bf16 %v2215_v3, %v2213_v56 }
 0x527   : > { %v2218_v49 = vpack.c.bf16 %v2216_v0, %v2214_v43 }
 0x529   : > { %2251 = vmatprep.mubr.bf16.mxu1 %v2218_v49 }
 0x52a   : > { %2252 = vmatmul.mubr.bf16.vlgmr.msra.gmra.mxu1 %v2217_v20 }
 0x52b   : > { %2499 = vmatpush1.msra.mxu1 %v4744_v1  ;;  %2532 = vmatprep.mubr.f32.mxu1 %v5158_v53 }
 0x52c   : > { %2645 = vmatprep.subr.mxu1 %v4751_v54 }
 0x53e   : > { %v3205_v32 = vpop.f32.mrf.mxu0 }
 0x540   : > { %v3206_v12 = vpop.f32.mrf.mxu0 }
 0x541   : > { %v3207_v55 = vadd.f32 %v3206_v12, %v3205_v32 }
 0x542   : > { %v3208_v33 = vpop.f32.mrf.mxu0 }
 0x543   : > { %v2384_v42 = vsel %vm845_vm1, %v3207_v55, -inf }
 0x544   : > { %v3209_v57 = vpop.f32.mrf.mxu0 }
 0x545   : > { %v3210_v41 = vadd.f32 %v3209_v57, %v3208_v33 }
 0x546   : > { %v3211_v39 = vpop.f32.mrf.mxu0 }
 0x547   : > { %v2391_v48 = vsel %vm845_vm1, %v3210_v41, -inf }
 0x548   : > { %v3212_v19 = vpop.f32.mrf.mxu0 }
 0x549   : > { %v3213_v4 = vadd.f32 %v3212_v19, %v3211_v39 }
 0x54a   : > { %v3214_v23 = vpop.f32.mrf.mxu0 }
 0x54b   : > { %v2385_v51 = vsel %vm845_vm1, %v3213_v4, -inf }
 0x54c   : > { %v3215_v27 = vpop.f32.mrf.mxu0 }
 0x54d   : > { %v3216_v30 = vadd.f32 %v3215_v27, %v3214_v23 }
 0x54e   : > { %v3217_v46 = vpop.f32.mrf.mxu0 }
 0x54f   : > { %v2392_v24 = vsel %vm845_vm1, %v3216_v30, -inf }
 0x550   : > { %v3218_v14 = vpop.f32.mrf.mxu0 }
 0x551   : > { %v3219_v40 = vadd.f32 %v3218_v14, %v3217_v46 }
 0x552   : > { %v3220_v38 = vpop.f32.mrf.mxu0 }
 0x553   : > { %v2386_v31 = vsel %vm845_vm1, %v3219_v40, -inf }
 0x554   : > { %v3221_v60 = vpop.f32.mrf.mxu0  ;;  %v2387_v34 = vmax.f32 %v2384_v42, %v2386_v31 }
 0x555   : > { %v3222_v63 = vadd.f32 %v3221_v60, %v3220_v38 }
 0x556   : > { %v3223_v44 = vpop.f32.mrf.mxu0 }
 0x557   : > { %v2393_v61 = vsel %vm845_vm1, %v3222_v63, -inf }
 0x558   : > { %v3224_v9 = vpop.f32.mrf.mxu0  ;;  %v2394_v17 = vmax.f32 %v2391_v48, %v2393_v61 }
 0x559   : > { %v3225_v54 = vadd.f32 %v3224_v9, %v3223_v44 }
 0x55a   : > { %v3226_v8 = vpop.f32.mrf.mxu0 }
 0x55b   : > { %v2388_v45 = vsel %vm845_vm1, %v3225_v54, -inf }
 0x55c   : > { %v2389_v5 = vmax.f32 %v2385_v51, %v2388_v45  ;;  %v3227_v52 = vpop.f32.mrf.mxu0 }
 0x55d   : > { %v3228_v36 = vadd.f32 %v3227_v52, %v3226_v8 }
 0x55e   : > { %v2390_v11 = vmax.f32 %v2387_v34, %v2389_v5 }
 0x55f   : > { %v2395_v58 = vsel %vm845_vm1, %v3228_v36, -inf }
 0x560   : > { %v2398_v59 = vsub.f32 %v3207_v55, %v2390_v11  ;;  %v2400_v50 = vsub.f32 %v3213_v4, %v2390_v11  ;;  %v2402_v15 = vsub.f32 %v3219_v40, %v2390_v11  ;;  %v2404_v3 = vsub.f32 %v3225_v54, %v2390_v11 }
 0x561   : > { %v2396_v43 = vmax.f32 %v2392_v24, %v2395_v58 }
 0x562   : > { %v2406_v0 = vmul.f32 1.442695, %v2398_v59  ;;  %v2410_v56 = vmul.f32 1.442695, %v2400_v50  ;;  %v2414_v49 = vmul.f32 1.442695, %v2402_v15 }
 0x563   : > { %v2418_v20 = vmul.f32 1.442695, %v2404_v3  ;;  %v2397_v32 = vmax.f32 %v2394_v17, %v2396_v43 }
 0x564   : > { %3404 = vpow2.f32 %v2406_v0 }
 0x565   : > { %3406 = vpow2.f32 %v2410_v56  ;;  %v2399_v12 = vsub.f32 %v3210_v41, %v2397_v32  ;;  %v2401_v33 = vsub.f32 %v3216_v30, %v2397_v32  ;;  %v2403_v57 = vsub.f32 %v3222_v63, %v2397_v32 }
 0x566   : > { %3408 = vpow2.f32 %v2414_v49  ;;  %v2405_v39 = vsub.f32 %v3228_v36, %v2397_v32 }
 0x567   : > { %3410 = vpow2.f32 %v2418_v20  ;;  %v2408_v19 = vmul.f32 1.442695, %v2399_v12  ;;  %v2412_v23 = vmul.f32 1.442695, %v2401_v33  ;;  %v2416_v27 = vmul.f32 1.442695, %v2403_v57 }
 0x568   : > { %v2420_v46 = vmul.f32 1.442695, %v2405_v39 }
 0x569   : > { %3412 = vpow2.f32 %v2408_v19 }
 0x56a   : > { %3414 = vpow2.f32 %v2412_v23 }
 0x56b   : > { %3416 = vpow2.f32 %v2416_v27 }
 0x56c   : > { %3418 = vpow2.f32 %v2420_v46 }
 0x571   : > { %v3405_v14 = vpop.eup %3404 }
 0x572   : > { %v3407_v38 = vpop.eup %3406  ;;  %v2422_v60 = vsel %vm845_vm1, %v3405_v14, 0.0  ;;  %2920 = vmatmul.mubr.msk.f32.vlgmr.msra.gmra.mxu1 %vm845_vm1, %v3405_v14 }
 0x573   : > { %v3409_v40 = vpop.eup %3408  ;;  %v2423_v55 = vsel %vm845_vm1, %v3407_v38, 0.0  ;;  %2646 = vmatpush1.msra.mxu1 %v4744_v1  ;;  %2538 = vmatprep.mubr.f32.mxu1 %v5158_v53 }
 0x574   : > { %v3411_v44 = vpop.eup %3410  ;;  %v2424_v4 = vadd.f32 %v2423_v55, %v2422_v60  ;;  %v2425_v9 = vsel %vm845_vm1, %v3409_v40, 0.0 }
 0x575   : > { %v2427_v63 = vsel %vm845_vm1, %v3411_v44, 0.0 }
 0x576   : > { %v3413_v31 = vpop.eup %3412  ;;  %v2426_v54 = vadd.f32 %v2425_v9, %v2424_v4 }
 0x577   : > { %v3415_v42 = vpop.eup %3414  ;;  %2921 = vmatmul.mubr.msk.f32.gmra.mxu1 %vm845_vm1, %v3413_v31  ;;  %v2429_v8 = vsel %vm845_vm1, %v3413_v31, 0.0 }
 0x578   : > { %v3417_v41 = vpop.eup %3416  ;;  %v2428_v51 = vadd.f32 %v2427_v63, %v2426_v54  ;;  %2544 = vmatprep.mubr.f32.mxu1 %v5158_v53  ;;  %v2430_v1 = vsel %vm845_vm1, %v3415_v42, 0.0 }
 0x579   : > { %v3419_v30 = vpop.eup %3418  ;;  %v2431_v45 = vadd.f32 %v2430_v1, %v2429_v8  ;;  %v2432_v34 = vsel %vm845_vm1, %v3417_v41, 0.0 }
 0x57a   : > { %3420 = vrcp.f32 %v2428_v51  ;;  %v2434_v52 = vsel %vm845_vm1, %v3419_v30, 0.0 }
 0x57b   : > { %2922 = vmatmul.mubr.msk.f32.gmra.mxu1 %vm845_vm1, %v3407_v38  ;;  %v2433_v5 = vadd.f32 %v2432_v34, %v2431_v45 }
 0x57c   : > { %2550 = vmatprep.mubr.f32.mxu1 %v5158_v53 }
 0x57d   : > { %v2435_v36 = vadd.f32 %v2434_v52, %v2433_v5 }
 0x57f   : > { %2923 = vmatmul.mubr.msk.f32.gmra.mxu1 %vm845_vm1, %v3415_v42  ;;  %3422 = vrcp.f32 %v2435_v36 }
 0x580   : > { %2556 = vmatprep.mubr.f32.mxu1 %v5158_v53 }
 0x583   : > { %2924 = vmatmul.mubr.msk.f32.gmra.mxu1 %vm845_vm1, %v3409_v40 }
 0x584   : > { %2562 = vmatprep.mubr.f32.mxu1 %v5158_v53 }
 0x587   : > { %v3421_v61 = vpop.eup %3420  ;;  %2925 = vmatmul.mubr.msk.f32.gmra.mxu1 %vm845_vm1, %v3417_v41 }
 0x588   : > { %2568 = vmatprep.mubr.f32.mxu1 %v5158_v53  ;;  %v2438_v11 = vmul.f32 %v3421_v61, %v2428_v51 }
 0x58a   : > { %v2440_v24 = vsub.f32 2.0, %v2438_v11 }
 0x58b   : > { %2926 = vmatmul.mubr.msk.f32.gmra.mxu1 %vm845_vm1, %v3411_v44 }
 0x58c   : > { %v3423_v48 = vpop.eup %3422  ;;  %2574 = vmatprep.mubr.f32.mxu1 %v5158_v53  ;;  %v2442_v59 = vmul.f32 %v3421_v61, %v2440_v24 }
 0x58d   : > { %v2439_v58 = vmul.f32 %v3423_v48, %v2435_v36 }
 0x58f   : > { %2927 = vmatmul.mubr.msk.f32.gmra.mxu1 %vm845_vm1, %v3419_v30  ;;  %v2441_v50 = vsub.f32 2.0, %v2439_v58 }
 0x590   : > { %2679 = vmatprep.mubr.f32.mxu1 %v5158_v53 }
 0x591   : > { %v2443_v15 = vmul.f32 %v3423_v48, %v2441_v50 }
 0x593   : > { %2928 = vmatmul.mubr.msk.f32.vlgmr.msra.gmra.mxu1 %vm845_vm1, %v2442_v59 }
 0x594   : > { %2685 = vmatprep.mubr.f32.mxu1 %v5158_v53 }
 0x597   : > { %2929 = vmatmul.mubr.msk.f32.gmra.mxu1 %vm845_vm1, %v2443_v15 }
 0x5ea   : > { %v3167_v3 = vpop.f32.mrf.mxu1 }
 0x5ec   : > { %v3168_v17 = vpop.f32.mrf.mxu1 }
 0x5ed   : > { %v3169_v43 = vadd.f32 %v3168_v17, %v3167_v3 }
 0x5ee   : > { %v3170_v0 = vpop.f32.mrf.mxu1 }
 0x5ef   : > { %v2254_v56 = vadd.f32 %v3169_v43, %v5246_v62 }
 0x5f0   : > { %v3171_v49 = vpop.f32.mrf.mxu1 }
 0x5f1   : > { %2918 = vst.msk [vmem:[%s4718_s18 + $0x20] sm:$0xff] %vm425_vm0, %v2254_v56  ;;  %v3172_v20 = vadd.f32 %v3171_v49, %v3170_v0 }
 0x5f3   : > { %v2257_v32 = vadd.f32 %v3172_v20, %v5246_v62 }
 0x5f5   : > { %2919 = vst.msk [vmem:[%s4718_s18 + $0x28] sm:$0xff] %vm425_vm0, %v2257_v32 }
 0x632   : > { %v2534_v12 = vpop.f32.mrf.mxu1 }
 0x633   : > { %v2581_v30 = vmul.f32 %v2534_v12, %v5254_v29 }
 0x634   : > { %v2536_v33 = vpop.f32.mrf.mxu1 }
 0x635   : > { %v2582_v41 = vmul.f32 %v2536_v33, %v5252_v25 }
 0x637   : > { %v2540_v53 = vpop.f32.mrf.mxu1 }
 0x638   : > { %v2583_v54 = vmul.f32 %v2540_v53, %v5249_v7 }
 0x639   : > { %v2542_v57 = vpop.f32.mrf.mxu1 }
 0x63a   : > { %v2584_v51 = vmul.f32 %v2542_v57, %v5222_v35 }
 0x63b   : > { %v2546_v39 = vpop.f32.mrf.mxu1 }
 0x63c   : > { %v2585_v42 = vmul.f32 %v2546_v39, %v5250_v16 }
 0x63d   : > { %v2548_v19 = vpop.f32.mrf.mxu1 }
 0x63e   : > { %v2586_v9 = vmul.f32 %v2548_v19, %v5248_v22  ;;  %v2597_v5 = vadd.f32 %v2585_v42, %v2581_v30 }
 0x63f   : > { %v2552_v23 = vpop.f32.mrf.mxu1 }
 0x640   : > { %v2587_v44 = vmul.f32 %v2552_v23, %v5247_v26  ;;  %v2600_v16 = vadd.f32 %v2586_v9, %v2582_v41 }
 0x641   : > { %v2554_v27 = vpop.f32.mrf.mxu1 }
 0x642   : > { %v2588_v31 = vmul.f32 %v2554_v27, %v5220_v10  ;;  %v2603_v22 = vadd.f32 %v2587_v44, %v2583_v54 }
 0x643   : > { %v2558_v46 = vpop.f32.mrf.mxu1 }
 0x644   : > { %v2589_v10 = vmul.f32 %v2558_v46, %v5255_v47  ;;  %v2606_v34 = vadd.f32 %v2588_v31, %v2584_v51 }
 0x645   : > { %v2560_v14 = vpop.f32.mrf.mxu1 }
 0x646   : > { %v2590_v1 = vmul.f32 %v2560_v14, %v5253_v6  ;;  %v2598_v29 = vadd.f32 %v2597_v5, %v2589_v10 }
 0x647   : > { %v2564_v38 = vpop.f32.mrf.mxu1 }
 0x648   : > { %v2591_v63 = vmul.f32 %v2564_v38, %v5251_v28 }
 0x649   : > { %v2566_v60 = vpop.f32.mrf.mxu1 }
 0x64a   : > { %v2592_v26 = vmul.f32 %v2566_v60, %v4411_v37  ;;  %v2604_v35 = vadd.f32 %v2603_v22, %v2591_v63  ;;  %v2601_v37 = vadd.f32 %v2600_v16, %v2590_v1 }
 0x64b   : > { %v2570_v40 = vpop.f32.mrf.mxu1 }
 0x64c   : > { %v2593_v6 = vmul.f32 %v2570_v40, %v5256_v18  ;;  %v2607_v36 = vadd.f32 %v2606_v34, %v2592_v26 }
 0x64d   : > { %v2572_v55 = vpop.f32.mrf.mxu1 }
 0x64e   : > { %v2594_v28 = vmul.f32 %v2572_v55, %v4413_v13 }
 0x64f   : > { %v2576_v4 = vpop.f32.mrf.mxu1 }
 0x650   : > { %v2595_v7 = vmul.f32 %v2576_v4, %v4419_v21  ;;  %v2602_v47 = vadd.f32 %v2601_v37, %v2594_v28  ;;  %v2599_v21 = vadd.f32 %v2598_v29, %v2593_v6 }
 0x651   : > { %v2578_v8 = vpop.f32.mrf.mxu1 }
 0x652   : > { %v2596_v25 = vmul.f32 %v2578_v8, %v4427_v2  ;;  %v2605_v61 = vadd.f32 %v2604_v35, %v2595_v7 }
 0x653   : > { %v2681_v45 = vpop.f32.mrf.mxu1 }
 0x654   : > { %v2608_v48 = vadd.f32 %v2607_v36, %v2596_v25  ;;  %v2692_v59 = vmul.f32 %v2681_v45, %v2599_v21 }
 0x655   : > { %v2683_v52 = vpop.f32.mrf.mxu1 }
 0x656   : > { %v2693_v13 = vmul.f32 %v2683_v52, %v2602_v47 }
 0x657   : > { %v2687_v11 = vpop.f32.mrf.mxu1 }
 0x658   : > { %v2694_v24 = vmul.f32 %v2687_v11, %v2605_v61 }
 0x659   : > { %v2689_v58 = vpop.f32.mrf.mxu1 }
 0x65a   : > { %v2695_v2 = vmul.f32 %v2689_v58, %v2608_v48  ;;  %v2696_v15 = vpack.c.bf16 %v2694_v24, %v2692_v59 }
 0x65c   : > { %v2697_v50 = vpack.c.bf16 %v2695_v2, %v2693_v13 }
 0x65e   : > { %2730 = vmatprep.mubr.bf16.mxu0 %v2697_v50 }
 0x65f   : > { %2731 = vmatmul.mubr.bf16.vlgmr.msra.gmra.mxu0 %v2696_v15 }
 0x71f   : > { %v3245_v18 = vpop.f32.mrf.mxu0 }
 0x721   : > { %v3246_v3 = vpop.f32.mrf.mxu0 }
 0x722   : > { %v3247_v17 = vadd.f32 %v3246_v3, %v3245_v18 }
 0x723   : > { %v3248_v43 = vpop.f32.mrf.mxu0 }
 0x724   : > { %v2733_v0 = vadd.f32 %v3247_v17, %v5246_v62 }
 0x725   : > { %v3249_v56 = vpop.f32.mrf.mxu0 }
 0x726   : > { %2930 = vst.msk [vmem:[%s4718_s18 + $0x30] sm:$0xff] %vm425_vm0, %v2733_v0  ;;  %v3250_v49 = vadd.f32 %v3249_v56, %v3248_v43 }
 0x728   : > { %v2736_v20 = vadd.f32 %v3250_v49, %v5246_v62 }
 0x72a   : > { %2931 = vst.msk [vmem:[%s4718_s18 + $0x38] sm:$0xff] %vm425_vm0, %v2736_v20 }
 0x72b   : > { %3487 = shalt.err (!%p3484_p5)
}
 0x72c   : > { %s3488_s15 = scalar_lea.hbm %s4979_s17, 1024  ;;  %s3492_s8 = scalar_lea.hbm %s5040_s7, 2048 }
 0x72d   : > { %p3489_p6 = scmp.ne.s32.totalorder %s4979_s17, %s3488_s15  ;;  %p3493_p10 = scmp.lt.s32.totalorder %s4979_s17, %s5040_s7 }
 0x72e   : > { %p3494_p11 = scmp.lt.s32.totalorder %s3492_s8, %s3488_s15 }
 0x72f   : > { %p3490_p7 = pnand %p3489_p6, %p3637_p4 }
 0x730   : > { %p3495_p12 = por %p3494_p11, %p3493_p10 }
 0x731   : > { %p3491_p9 = pneg %p3490_p7 }
 0x733   : > { %p3496_p13 = pnand %p3495_p12, %p3491_p9 }
 0x735   : > { %3499 = shalt.err (!%p3496_p13)
}
 0x736   : > { %s3555_s16 = smov 128   ;;  %s3556_s22 = smov 8  }
 0x737   : > { %3251 = dma.vmem_to_hbm [thread:$0]  (%p3637_p4), %s4981_s10, 1024, %s4979_s17, %s4988_s27, %s3555_s16, %s3555_s16, %s3556_s22  }
 0x738 PF: > { %p3257_p0 = scmp.ge.s32.totalorder %s3550_s29, 2  ;;  %s2773_s19 = sand.u32 1, %s3530_s24  }
 0x739   : > { %s2774_s20 = scalar_lea.sflag [#allocation3], %s2773_s19 }
 0x73a   : > { %p3254_p1 = pnand %p3257_p0, %p3644_p8 }
 0x73c   : > { %p3255_p2 = pneg %p3254_p1 }
 0x73e   : > { %3525 = dma.done.wait (%p3255_p2), %s2774_s20, 1024  }
 0x73f   : > { %3527 = vsyncadd (%p3255_p2), %s2774_s20, 4294966272  ;;  %s20_s29 = sadd.s32 1, %s3550_s29   ;;  %s5257_s24 = smov %s3534_s25 }
 0x740   : > { %p17_p3 = scmp.ge.s32.totalorder %s20_s29, 4   ;;  %s5258_s25 = smov %s3538_s26 }
 0x741   : > { %s5259_s26 = smov %s3650_s14  ;;  %s5260_s27 = smov %s3546_s28 }
 0x742   : > { %s5261_s28 = smov %s5263_s9  ;;  %19 = sbr.rel (!%p17_p3) target bundleno = 4 (0x4), region = 86 }
 0x747   :  { %2779 = vsyncpa [#allocation3], 1 }
 0x748   :  { %2781 = vsyncpa [#allocation3 + $0x1], 1 }

</bundles_post_ra>
